<compile_context>
chip_gen: v7x
topology: tpu7x:2x2x1
jax: 0.10.0
libtpu: 0.0.40
codegen_flags: <defaults>
</compile_context>

<pallas_src>
import functools

import jax
import jax.numpy as jnp
from jax import lax
from jax.experimental import pallas as pl
from jax.experimental.pallas import tpu as pltpu


def _round_up(x, m):
    return (x + m - 1) // m * m


def _compiler_params(semantics, est_bytes):
    # size scoped VMEM to the working set (x4 headroom for double-buffering),
    # clamped to a budget that is safe on v5e/v6e/v7x.
    limit = int(min(max(4 * est_bytes, 8 << 20), 32 << 20))
    return pltpu.CompilerParams(dimension_semantics=semantics,
                                vmem_limit_bytes=limit)


# ----------------------------------------------------------------------------
# Kernel A: fused projection (all heads + residual in one bf16 matmul) and
#           per-head attention scores via VPU reductions.
# ----------------------------------------------------------------------------
def _project_kernel(x_ref, w_ref, a_ref, hf_ref, res_ref, e_ref, *, H, Dp):
    x = x_ref[...].astype(jnp.bfloat16)              # [BM, Fin_pad]
    w = w_ref[...]                                   # bf16 [Fin_pad, H*Dp + Dp]
    hf_all = jnp.dot(x, w, preferred_element_type=jnp.float32)  # [BM, H*Dp+Dp]

    hf = hf_all[:, :H * Dp]                          # per-head features (f32)
    res = hf_all[:, H * Dp:]                         # residual projection
    hf_ref[...] = hf.astype(jnp.bfloat16)
    res_ref[...] = res

    a = a_ref[...]                                   # [2H, Dp] (a_dst | a_src)
    cols = []
    for h in range(H):                               # e_dst[i] = <h_i, a_dst_h>
        hf_h = hf[:, h * Dp:(h + 1) * Dp]
        cols.append(jnp.sum(hf_h * a[h:h + 1, :], axis=-1, keepdims=True))
    for h in range(H):                               # e_src[j] = <h_j, a_src_h>
        hf_h = hf[:, h * Dp:(h + 1) * Dp]
        cols.append(jnp.sum(hf_h * a[H + h:H + h + 1, :], axis=-1,
                            keepdims=True))
    e_ref[...] = jnp.concatenate(cols, axis=-1)      # [BM, 2H]


# ----------------------------------------------------------------------------
# Kernel B: flash-style masked-softmax attention + head average + residual +
#           optional ELU + optional L2 normalize.
# ----------------------------------------------------------------------------
def _attn_kernel(e_dst_ref, e_src_ref, bias_ref, hf_ref, res_ref, o_ref,
                 m_s, l_s, acc_s, *, H, Dp, alpha, use_act, normalize):
    j = pl.program_id(1)

    @pl.when(j == 0)
    def _():
        m_s[...] = jnp.full_like(m_s, -1e30)
        l_s[...] = jnp.zeros_like(l_s)
        acc_s[...] = jnp.zeros_like(acc_s)

    bias = bias_ref[...].astype(jnp.float32)         # [BM, BK] (0 or -1e9)
    e_dst = e_dst_ref[...]                           # [BM, H]
    e_src = e_src_ref[...]                           # [H, BK]
    hf_src = hf_ref[...]                             # bf16 [BK, H*Dp]
    alpha_f = jnp.float32(alpha)

    for h in range(H):                               # small static head loop
        logits = e_dst[:, h:h + 1] + e_src[h:h + 1, :]              # [BM, BK]
        logits = jnp.where(logits > 0, logits, alpha_f * logits)    # LeakyReLU
        logits = logits + bias                                       # mask

        m_prev = m_s[:, h:h + 1]
        m_new = jnp.maximum(m_prev, jnp.max(logits, axis=-1, keepdims=True))
        corr = jnp.exp(m_prev - m_new)
        p = jnp.exp(logits - m_new)                                  # [BM, BK]

        l_s[:, h:h + 1] = corr * l_s[:, h:h + 1] + jnp.sum(
            p, axis=-1, keepdims=True)
        m_s[:, h:h + 1] = m_new

        hf_h = hf_src[:, h * Dp:(h + 1) * Dp]                        # bf16
        acc_s[:, h * Dp:(h + 1) * Dp] = (
            corr * acc_s[:, h * Dp:(h + 1) * Dp]
            + jnp.dot(p.astype(jnp.bfloat16), hf_h,
                      preferred_element_type=jnp.float32))

    @pl.when(j == pl.num_programs(1) - 1)
    def _():
        out = jnp.zeros(o_ref.shape, jnp.float32)
        for h in range(H):
            inv_l = pl.reciprocal(l_s[:, h:h + 1], approx=True)      # EUP
            out = out + acc_s[:, h * Dp:(h + 1) * Dp] * inv_l
        out = out * jnp.float32(1.0 / H)             # average heads
        out = out + res_ref[...]                     # residual projection
        if use_act:                                  # ELU (alpha=1)
            out = jnp.where(out > 0, out,
                            jnp.exp(jnp.minimum(out, 0.0)) - 1.0)
        if normalize:                                # per-row L2 normalize
            ssq = jnp.sum(out * out, axis=-1, keepdims=True)
            out = out * lax.rsqrt(jnp.maximum(ssq, 1e-24))           # EUP
        o_ref[...] = out.astype(o_ref.dtype)


# ----------------------------------------------------------------------------
# One ISNE layer = kernel A + kernel B.
# ----------------------------------------------------------------------------
def isne_layer(x_pad, bias, W, a_src, a_dst, W_res, *, num_heads, alpha,
               use_act, normalize, block_m=128, block_k=128):
    N_pad, Fin_pad = x_pad.shape
    H = num_heads
    Fin, HD = W.shape
    D = HD // H
    Dp = _round_up(D, 128)                           # lane-dense per-head dim

    # Pad weights per head and fold the residual projection into the same
    # matmul (one wide bf16 MXU call).
    W3 = jnp.pad(W.reshape(Fin, H, D),
                 ((0, Fin_pad - Fin), (0, 0), (0, Dp - D)))
    Wr = jnp.pad(W_res, ((0, Fin_pad - Fin), (0, Dp - D)))
    W_cat = jnp.concatenate([W3.reshape(Fin_pad, H * Dp), Wr],
                            axis=1).astype(jnp.bfloat16)
    a_all = jnp.concatenate(
        [jnp.pad(a_dst, ((0, 0), (0, Dp - D))),
         jnp.pad(a_src, ((0, 0), (0, Dp - D)))], axis=0).astype(jnp.float32)

    n_m = N_pad // block_m
    n_k = N_pad // block_k

    # ---------------- kernel A: projection + scores ----------------
    est_a = (block_m * Fin_pad * 4 + Fin_pad * (H * Dp + Dp) * 2
             + 2 * H * Dp * 4 + block_m * H * Dp * 2 + block_m * Dp * 4
             + block_m * 2 * H * 4)
    hf, res, e = pl.pallas_call(
        functools.partial(_project_kernel, H=H, Dp=Dp),
        out_shape=(jax.ShapeDtypeStruct((N_pad, H * Dp), jnp.bfloat16),
                   jax.ShapeDtypeStruct((N_pad, Dp), jnp.float32),
                   jax.ShapeDtypeStruct((N_pad, 2 * H), jnp.float32)),
        grid_spec=pltpu.PrefetchScalarGridSpec(
            num_scalar_prefetch=0, grid=(n_m,),
            in_specs=[pl.BlockSpec((block_m, Fin_pad), lambda i: (i, 0)),
                      pl.BlockSpec((Fin_pad, H * Dp + Dp), lambda i: (0, 0)),
                      pl.BlockSpec((2 * H, Dp), lambda i: (0, 0))],
            out_specs=(pl.BlockSpec((block_m, H * Dp), lambda i: (i, 0)),
                       pl.BlockSpec((block_m, Dp), lambda i: (i, 0)),
                       pl.BlockSpec((block_m, 2 * H), lambda i: (i, 0)))),
        compiler_params=_compiler_params(("parallel",), est_a),
    )(x_pad, W_cat, a_all)

    e_dst = e[:, :H]                                 # [N_pad, H]
    e_src_t = jnp.transpose(e[:, H:])                # [H, N_pad] (tiny)

    # ---------------- kernel B: streaming attention ----------------
    est_b = (block_m * H * 4 + H * block_k * 4 + block_m * block_k * 2
             + block_k * H * Dp * 2 + block_m * Dp * 4 + block_m * Dp * 4
             + block_m * H * Dp * 4 + 2 * block_m * H * 4)
    out_pad = pl.pallas_call(
        functools.partial(_attn_kernel, H=H, Dp=Dp, alpha=alpha,
                          use_act=use_act, normalize=normalize),
        out_shape=jax.ShapeDtypeStruct((N_pad, Dp), jnp.float32),
        grid_spec=pltpu.PrefetchScalarGridSpec(
            num_scalar_prefetch=0, grid=(n_m, n_k),
            in_specs=[pl.BlockSpec((block_m, H), lambda i, j: (i, 0)),
                      pl.BlockSpec((H, block_k), lambda i, j: (0, j)),
                      pl.BlockSpec((block_m, block_k), lambda i, j: (i, j)),
                      pl.BlockSpec((block_k, H * Dp), lambda i, j: (j, 0)),
                      pl.BlockSpec((block_m, Dp), lambda i, j: (i, 0))],
            out_specs=pl.BlockSpec((block_m, Dp), lambda i, j: (i, 0)),
            scratch_shapes=[pltpu.VMEM((block_m, H), jnp.float32),
                            pltpu.VMEM((block_m, H), jnp.float32),
                            pltpu.VMEM((block_m, H * Dp), jnp.float32)]),
        compiler_params=_compiler_params(("parallel", "arbitrary"), est_b),
    )(e_dst, e_src_t, bias, hf, res)
    return out_pad


# ----------------------------------------------------------------------------
# Parameter init (deterministic) + model forward (glue in plain JAX)
# ----------------------------------------------------------------------------
def init_isne_params(key, in_features, hidden_features, out_features,
                     num_layers, num_heads):
    dims = ([in_features] + [hidden_features] * (num_layers - 1)
            + [out_features]) if num_layers > 1 else [in_features, out_features]
    params = []
    for li in range(len(dims) - 1):
        fin, fout = dims[li], dims[li + 1]
        key, k1, k2, k3, k4 = jax.random.split(key, 5)
        scale = 1.0 / jnp.sqrt(jnp.float32(fin))
        params.append(dict(
            W=jax.random.normal(k1, (fin, num_heads * fout), jnp.float32) * scale,
            a_src=jax.random.normal(k2, (num_heads, fout), jnp.float32) * 0.1,
            a_dst=jax.random.normal(k3, (num_heads, fout), jnp.float32) * 0.1,
            W_res=jax.random.normal(k4, (fin, fout), jnp.float32) * scale,
        ))
    return params


def build_bias(edge_index, num_nodes, n_pad, add_self_loops=True):
    """Dense masked-softmax bias: 0 where edge src->dst exists, -1e9 otherwise.

    Computed ONCE for the whole model (all layers share it).  Padded rows
    always get a self-loop so their softmax stays well-defined (they are
    sliced off at the end).
    """
    src, dst = edge_index[0], edge_index[1]
    adj = jnp.zeros((n_pad, n_pad), jnp.float32)
    adj = adj.at[dst, src].set(1.0)                  # adj[dst, src]: src -> dst
    idx = jnp.arange(n_pad)
    if add_self_loops:
        adj = adj.at[idx, idx].set(1.0)
    else:
        pad_self = (idx >= num_nodes).astype(jnp.float32)
        adj = adj.at[idx, idx].max(pad_self)
    return jnp.where(adj > 0, 0.0, -1e9).astype(jnp.bfloat16)


def isne_model_forward(x, edge_index, params, *, num_heads=4, alpha=0.2,
                       normalize_features=True, add_self_loops=True,
                       block_m=128, block_k=128):
    if normalize_features:                           # F.normalize(x, p=2, dim=1)
        ssq = jnp.sum(x * x, axis=1, keepdims=True)
        x = x * lax.rsqrt(jnp.maximum(ssq, 1e-24))

    N, Fin = x.shape
    N_pad = _round_up(max(N, block_m), block_m)
    Fin_pad = _round_up(Fin, 128)
    x_pad = jnp.pad(x, ((0, N_pad - N), (0, Fin_pad - Fin))).astype(jnp.float32)

    bias = build_bias(edge_index, N, N_pad, add_self_loops)

    n_layers = len(params)
    out_dim = params[-1]['W_res'].shape[1]
    for i, p in enumerate(params):
        use_act = i < n_layers - 1                   # last layer: activation=None
        x_pad = isne_layer(x_pad, bias, p['W'], p['a_src'], p['a_dst'],
                           p['W_res'], num_heads=num_heads, alpha=alpha,
                           use_act=use_act, normalize=normalize_features,
                           block_m=block_m, block_k=block_k)
    return x_pad[:N, :out_dim]


# ----------------------------------------------------------------------------
if __name__ == "__main__":
    key = jax.random.PRNGKey(0)
    num_nodes = 16
    in_features, hidden_features, out_features = 8, 16, 8
    num_layers, num_heads = 2, 4
    num_edges = 32

    kx, ke1, ke2, kp = jax.random.split(key, 4)
    x = jax.random.normal(kx, (num_nodes, in_features), jnp.float32)
    src = jax.random.randint(ke1, (num_edges,), 0, num_nodes)
    dst = jax.random.randint(ke2, (num_edges,), 0, num_nodes)
    edge_index = jnp.stack([src, dst], axis=0)       # [2, num_edges]

    params = init_isne_params(kp, in_features, hidden_features, out_features,
                              num_layers, num_heads)

    out = isne_model_forward(x, edge_index, params, num_heads=num_heads,
                             alpha=0.2, normalize_features=True,
                             add_self_loops=True)
    out = jax.block_until_ready(out)
    assert out.shape == (num_nodes, out_features)
    assert bool(jnp.all(jnp.isfinite(out)))
    print("KERNEL_OK")
</pallas_src>

<mosaic_0001>
module attributes {stable_mosaic.version = 11 : i64} {
  func.func @_project_kernel(%arg0: i32, %arg1: memref<128x128xf32, #tpu.memory_space<vmem>>, %arg2: memref<128x640xbf16, #tpu.memory_space<vmem>>, %arg3: memref<8x128xf32, #tpu.memory_space<vmem>>, %arg4: memref<128x512xbf16, #tpu.memory_space<vmem>>, %arg5: memref<128x128xf32, #tpu.memory_space<vmem>>, %arg6: memref<128x8xf32, #tpu.memory_space<vmem>>) attributes {dimension_semantics = [#tpu.dimension_semantics<parallel>], iteration_bounds = array<i64: 1>, scalar_prefetch = 0 : i64, scratch_operands = 0 : i64, tpu.core_type = #tpu.core_type<tc>, window_params = [{transform_indices = @transform_0, window_bounds = array<i64: 128, 128>}, {pipeline_mode = #tpu.pipeline_mode<synchronous>, transform_indices = @transform_1, window_bounds = array<i64: 128, 640>}, {pipeline_mode = #tpu.pipeline_mode<synchronous>, transform_indices = @transform_2, window_bounds = array<i64: 8, 128>}, {transform_indices = @transform_3, window_bounds = array<i64: 128, 512>}, {transform_indices = @transform_4, window_bounds = array<i64: 128, 128>}, {transform_indices = @transform_5, window_bounds = array<i64: 128, 8>}]} {
    %c0 = arith.constant 0 : index
    %c0_0 = arith.constant 0 : index
    %0 = vector.load %arg1[%c0, %c0_0] : memref<128x128xf32, #tpu.memory_space<vmem>>, vector<128x128xf32>
    %1 = arith.truncf %0 : vector<128x128xf32> to vector<128x128xbf16>
    %c0_1 = arith.constant 0 : index
    %c0_2 = arith.constant 0 : index
    %2 = vector.load %arg2[%c0_1, %c0_2] : memref<128x640xbf16, #tpu.memory_space<vmem>>, vector<128x640xbf16>
    %cst = arith.constant dense<0.000000e+00> : vector<128x640xf32>
    %3 = tpu.matmul %1, %2, %cst {dimension_numbers = #tpu.dot_dimension_numbers<[1], [0], [0], [1], [0, 0, 1, 1], [], []>} : vector<128x128xbf16>, vector<128x640xbf16>, vector<128x640xf32> -> vector<128x640xf32>
    %4 = vector.extract_strided_slice %3 {offsets = [0, 0], sizes = [128, 512], strides = [1, 1]} : vector<128x640xf32> to vector<128x512xf32>
    %5 = vector.extract_strided_slice %3 {offsets = [0, 512], sizes = [128, 128], strides = [1, 1]} : vector<128x640xf32> to vector<128x128xf32>
    %6 = arith.truncf %4 : vector<128x512xf32> to vector<128x512xbf16>
    %c0_3 = arith.constant 0 : index
    %c0_4 = arith.constant 0 : index
    %7 = vector.load %arg4[%c0_3, %c0_4] : memref<128x512xbf16, #tpu.memory_space<vmem>>, vector<128x512xbf16>
    tpu.vector_store %arg4[%c0_3, %c0_4], %6 {strides = array<i32>} : memref<128x512xbf16, #tpu.memory_space<vmem>>, vector<128x512xbf16>,
    %c0_5 = arith.constant 0 : index
    %c0_6 = arith.constant 0 : index
    %8 = vector.load %arg5[%c0_5, %c0_6] : memref<128x128xf32, #tpu.memory_space<vmem>>, vector<128x128xf32>
    tpu.vector_store %arg5[%c0_5, %c0_6], %5 {strides = array<i32>} : memref<128x128xf32, #tpu.memory_space<vmem>>, vector<128x128xf32>,
    %c0_7 = arith.constant 0 : index
    %c0_8 = arith.constant 0 : index
    %9 = vector.load %arg3[%c0_7, %c0_8] : memref<8x128xf32, #tpu.memory_space<vmem>>, vector<8x128xf32>
    %10 = vector.extract_strided_slice %4 {offsets = [0, 0], sizes = [128, 128], strides = [1, 1]} : vector<128x512xf32> to vector<128x128xf32>
    %11 = vector.extract_strided_slice %9 {offsets = [0, 0], sizes = [1, 128], strides = [1, 1]} : vector<8x128xf32> to vector<1x128xf32>
    %12 = vector.broadcast %11 : vector<1x128xf32> to vector<128x128xf32>
    %13 = arith.mulf %10, %12 : vector<128x128xf32>
    %cst_9 = arith.constant dense<0.000000e+00> : vector<128xf32>
    %14 = vector.multi_reduction <add>, %13, %cst_9 [1] : vector<128x128xf32> to vector<128xf32>
    %15 = vector.shape_cast %14 : vector<128xf32> to vector<128x1xf32>
    %16 = vector.extract_strided_slice %4 {offsets = [0, 128], sizes = [128, 128], strides = [1, 1]} : vector<128x512xf32> to vector<128x128xf32>
    %17 = vector.extract_strided_slice %9 {offsets = [1, 0], sizes = [1, 128], strides = [1, 1]} : vector<8x128xf32> to vector<1x128xf32>
    %18 = vector.broadcast %17 : vector<1x128xf32> to vector<128x128xf32>
    %19 = arith.mulf %16, %18 : vector<128x128xf32>
    %cst_10 = arith.constant dense<0.000000e+00> : vector<128xf32>
    %20 = vector.multi_reduction <add>, %19, %cst_10 [1] : vector<128x128xf32> to vector<128xf32>
    %21 = vector.shape_cast %20 : vector<128xf32> to vector<128x1xf32>
    %22 = vector.extract_strided_slice %4 {offsets = [0, 256], sizes = [128, 128], strides = [1, 1]} : vector<128x512xf32> to vector<128x128xf32>
    %23 = vector.extract_strided_slice %9 {offsets = [2, 0], sizes = [1, 128], strides = [1, 1]} : vector<8x128xf32> to vector<1x128xf32>
    %24 = vector.broadcast %23 : vector<1x128xf32> to vector<128x128xf32>
    %25 = arith.mulf %22, %24 : vector<128x128xf32>
    %cst_11 = arith.constant dense<0.000000e+00> : vector<128xf32>
    %26 = vector.multi_reduction <add>, %25, %cst_11 [1] : vector<128x128xf32> to vector<128xf32>
    %27 = vector.shape_cast %26 : vector<128xf32> to vector<128x1xf32>
    %28 = vector.extract_strided_slice %4 {offsets = [0, 384], sizes = [128, 128], strides = [1, 1]} : vector<128x512xf32> to vector<128x128xf32>
    %29 = vector.extract_strided_slice %9 {offsets = [3, 0], sizes = [1, 128], strides = [1, 1]} : vector<8x128xf32> to vector<1x128xf32>
    %30 = vector.broadcast %29 : vector<1x128xf32> to vector<128x128xf32>
    %31 = arith.mulf %28, %30 : vector<128x128xf32>
    %cst_12 = arith.constant dense<0.000000e+00> : vector<128xf32>
    %32 = vector.multi_reduction <add>, %31, %cst_12 [1] : vector<128x128xf32> to vector<128xf32>
    %33 = vector.shape_cast %32 : vector<128xf32> to vector<128x1xf32>
    %34 = vector.extract_strided_slice %4 {offsets = [0, 0], sizes = [128, 128], strides = [1, 1]} : vector<128x512xf32> to vector<128x128xf32>
    %35 = vector.extract_strided_slice %9 {offsets = [4, 0], sizes = [1, 128], strides = [1, 1]} : vector<8x128xf32> to vector<1x128xf32>
    %36 = vector.broadcast %35 : vector<1x128xf32> to vector<128x128xf32>
    %37 = arith.mulf %34, %36 : vector<128x128xf32>
    %cst_13 = arith.constant dense<0.000000e+00> : vector<128xf32>
    %38 = vector.multi_reduction <add>, %37, %cst_13 [1] : vector<128x128xf32> to vector<128xf32>
    %39 = vector.shape_cast %38 : vector<128xf32> to vector<128x1xf32>
    %40 = vector.extract_strided_slice %4 {offsets = [0, 128], sizes = [128, 128], strides = [1, 1]} : vector<128x512xf32> to vector<128x128xf32>
    %41 = vector.extract_strided_slice %9 {offsets = [5, 0], sizes = [1, 128], strides = [1, 1]} : vector<8x128xf32> to vector<1x128xf32>
    %42 = vector.broadcast %41 : vector<1x128xf32> to vector<128x128xf32>
    %43 = arith.mulf %40, %42 : vector<128x128xf32>
    %cst_14 = arith.constant dense<0.000000e+00> : vector<128xf32>
    %44 = vector.multi_reduction <add>, %43, %cst_14 [1] : vector<128x128xf32> to vector<128xf32>
    %45 = vector.shape_cast %44 : vector<128xf32> to vector<128x1xf32>
    %46 = vector.extract_strided_slice %4 {offsets = [0, 256], sizes = [128, 128], strides = [1, 1]} : vector<128x512xf32> to vector<128x128xf32>
    %47 = vector.extract_strided_slice %9 {offsets = [6, 0], sizes = [1, 128], strides = [1, 1]} : vector<8x128xf32> to vector<1x128xf32>
    %48 = vector.broadcast %47 : vector<1x128xf32> to vector<128x128xf32>
    %49 = arith.mulf %46, %48 : vector<128x128xf32>
    %cst_15 = arith.constant dense<0.000000e+00> : vector<128xf32>
    %50 = vector.multi_reduction <add>, %49, %cst_15 [1] : vector<128x128xf32> to vector<128xf32>
    %51 = vector.shape_cast %50 : vector<128xf32> to vector<128x1xf32>
    %52 = vector.extract_strided_slice %4 {offsets = [0, 384], sizes = [128, 128], strides = [1, 1]} : vector<128x512xf32> to vector<128x128xf32>
    %53 = vector.extract_strided_slice %9 {offsets = [7, 0], sizes = [1, 128], strides = [1, 1]} : vector<8x128xf32> to vector<1x128xf32>
    %54 = vector.broadcast %53 : vector<1x128xf32> to vector<128x128xf32>
    %55 = arith.mulf %52, %54 : vector<128x128xf32>
    %cst_16 = arith.constant dense<0.000000e+00> : vector<128xf32>
    %56 = vector.multi_reduction <add>, %55, %cst_16 [1] : vector<128x128xf32> to vector<128xf32>
    %57 = vector.shape_cast %56 : vector<128xf32> to vector<128x1xf32>
    %58 = tpu.concatenate %15, %21, %27, %33, %39, %45, %51, %57 in 1 : vector<128x1xf32>, vector<128x1xf32>, vector<128x1xf32>, vector<128x1xf32>, vector<128x1xf32>, vector<128x1xf32>, vector<128x1xf32>, vector<128x1xf32> -> vector<128x8xf32>
    %c0_17 = arith.constant 0 : index
    %c0_18 = arith.constant 0 : index
    %59 = vector.load %arg6[%c0_17, %c0_18] : memref<128x8xf32, #tpu.memory_space<vmem>>, vector<128x8xf32>
    tpu.vector_store %arg6[%c0_17, %c0_18], %58 {strides = array<i32>} : memref<128x8xf32, #tpu.memory_space<vmem>>, vector<128x8xf32>,
    return
  }
  func.func @transform_0(%arg0: i32) -> (i32, i32) {
    %c0_i32 = arith.constant 0 : i32
    %c0_i32_0 = arith.constant 0 : i32
    return %arg0, %c0_i32 : i32, i32
  }
  func.func @transform_1(%arg0: i32) -> (i32, i32) {
    %c0_i32 = arith.constant 0 : i32
    %c0_i32_0 = arith.constant 0 : i32
    %c0_i32_1 = arith.constant 0 : i32
    return %c0_i32, %c0_i32_0 : i32, i32
  }
  func.func @transform_2(%arg0: i32) -> (i32, i32) {
    %c0_i32 = arith.constant 0 : i32
    %c0_i32_0 = arith.constant 0 : i32
    %c0_i32_1 = arith.constant 0 : i32
    return %c0_i32, %c0_i32_0 : i32, i32
  }
  func.func @transform_3(%arg0: i32) -> (i32, i32) {
    %c0_i32 = arith.constant 0 : i32
    %c0_i32_0 = arith.constant 0 : i32
    return %arg0, %c0_i32 : i32, i32
  }
  func.func @transform_4(%arg0: i32) -> (i32, i32) {
    %c0_i32 = arith.constant 0 : i32
    %c0_i32_0 = arith.constant 0 : i32
    return %arg0, %c0_i32 : i32, i32
  }
  func.func @transform_5(%arg0: i32) -> (i32, i32) {
    %c0_i32 = arith.constant 0 : i32
    %c0_i32_0 = arith.constant 0 : i32
    return %arg0, %c0_i32 : i32, i32
  }
}

</mosaic_0001>

<bundles_post_ra>
// kernel: tpu_custom_call.1
= control target key start
LH: loop header
LB: loop body
LE: loop exit
PB: predicated region body
PF: predicated region fallthrough
CT: control target
= control target key end

     0   :  { %11 = vsyncpa [#allocation3], 0  ;;  %s2655_s0 = inlined_call_operand.hbm [shape: f32[128,128], index: 0, kind: input, shape index: {}]   ;;  %s2656_s1 = inlined_call_operand.hbm [shape: bf16[128,640], index: 1, kind: input, shape index: {}]   ;;  %s2657_s2 = inlined_call_operand.hbm [shape: f32[8,128], index: 2, kind: input, shape index: {}]   ;;  %s2658_s3 = inlined_call_operand.hbm [shape: bf16[128,512], index: 3, kind: output, shape index: {0}]   ;;  %s2659_s4 = inlined_call_operand.hbm [shape: f32[128,128], index: 4, kind: output, shape index: {1}]   ;;  %s2660_s5 = inlined_call_operand.vmem [shape: f32[128,8], index: 5, kind: output, shape index: {2}]  }
   0x1   :  { %12 = vsyncpa [#allocation6], 0 }
   0x2   :  { %13 = vsyncpa [#allocation4], 0 }
   0x3   :  { %14 = vsyncpa [#allocation10], 0  ;;  %s1847_s18 = smov [#allocation5]   ;;  %s1729_s22 = scalar_lea.hbm %s2656_s1, 5120 }
   0x4   :  { %s32_s19 = sshll.u32 %s1847_s18, 4  ;;  %p1730_p0 = scmp.ne.s32.totalorder %s2656_s1, %s1729_s22  ;;  %s33_s19 = int_to_ptr.vmem [resolvable:$true] %s32_s19 }
   0x5   :  { %p1733_p1 = scmp.lt.u32.totalorder %s1729_s22, %s2656_s1 }
   0x7   :  { %p1735_p2 = pnand %p1733_p1, %p1730_p0 }
   0x9   :  { %1738 = shalt.err (!%p1735_p2)
}
   0xa   :  { %s1739_s27 = scalar_lea.vmem %s33_s19, 5120  ;;  %p1744_p4 = scmp.lt.s32.totalorder %s33_s19, %s33_s19 }
   0xb   :  { %p1740_p3 = scmp.ne.s32.totalorder %s33_s19, %s1739_s27  ;;  %p1745_p5 = scmp.lt.s32.totalorder %s1739_s27, %s1739_s27 }
   0xd   :  { %p1746_p6 = por %p1745_p5, %p1744_p4 }
   0xf   :  { %p1747_p7 = pnand %p1746_p6, %p1740_p3 }
  0x11   :  { %1750 = shalt.err (!%p1747_p7)
}
  0x12   :  { %s1848_s28 = smov 320   ;;  %s1849_s29 = smov 20  }
  0x13   :  { %38 = dma.hbm_to_vmem [thread:$0]  %s2656_s1, 5120, %s33_s19, [#allocation6], %s1848_s28, %s1848_s28, %s1849_s29  }
  0x14   :  { %s1850_s7 = smov [#allocation2]   ;;  %s1751_s11 = scalar_lea.hbm %s2655_s0, 2048 }
  0x15   :  { %s20_s8 = sshll.u32 %s1850_s7, 4  ;;  %p1752_p8 = scmp.ne.s32.totalorder %s2655_s0, %s1751_s11  ;;  %s21_s8 = int_to_ptr.vmem [resolvable:$true] %s20_s8 }
  0x16   :  { %p1755_p9 = scmp.lt.u32.totalorder %s1751_s11, %s2655_s0 }
  0x18   :  { %p1757_p10 = pnand %p1755_p9, %p1752_p8 }
  0x1a   :  { %1760 = shalt.err (!%p1757_p10)
}
  0x1b   :  { %s1761_s16 = scalar_lea.vmem %s21_s8, 2048  ;;  %p1766_p12 = scmp.lt.s32.totalorder %s21_s8, %s21_s8 }
  0x1c   :  { %p1762_p11 = scmp.ne.s32.totalorder %s21_s8, %s1761_s16  ;;  %p1767_p13 = scmp.lt.s32.totalorder %s1761_s16, %s1761_s16 }
  0x1e   :  { %p1768_p0 = por %p1767_p13, %p1766_p12 }
  0x20   :  { %p1769_p1 = pnand %p1768_p0, %p1762_p11 }
  0x22   :  { %1772 = shalt.err (!%p1769_p1)
}
  0x23   :  { %s1851_s1 = smov 128   ;;  %s1852_s17 = smov 8  }
  0x24   :  { %26 = dma.hbm_to_vmem [thread:$0]  %s2655_s0, 2048, %s21_s8, [#allocation3], %s1851_s1, %s1851_s1, %s1852_s17  }
  0x25   :  { %s1853_s20 = smov [#allocation7]   ;;  %s1773_s24 = scalar_lea.hbm %s2657_s2, 128 }
  0x26   :  { %s45_s21 = sshll.u32 %s1853_s20, 4  ;;  %p1774_p2 = scmp.ne.s32.totalorder %s2657_s2, %s1773_s24  ;;  %s46_s21 = int_to_ptr.vmem [resolvable:$true] %s45_s21 }
  0x27   :  { %p1777_p3 = scmp.lt.u32.totalorder %s1773_s24, %s2657_s2 }
  0x29   :  { %p1779_p4 = pnand %p1777_p3, %p1774_p2 }
  0x2b   :  { %1782 = shalt.err (!%p1779_p4)
}
  0x2c   :  { %s1783_s29 = scalar_lea.vmem %s46_s21, 128  ;;  %p1788_p6 = scmp.lt.s32.totalorder %s46_s21, %s46_s21 }
  0x2d   :  { %p1784_p5 = scmp.ne.s32.totalorder %s46_s21, %s1783_s29  ;;  %p1789_p7 = scmp.lt.s32.totalorder %s1783_s29, %s1783_s29 }
  0x2f   :  { %p1790_p8 = por %p1789_p7, %p1788_p6 }
  0x31   :  { %p1791_p9 = pnand %p1790_p8, %p1784_p5 }
  0x33   :  { %1794 = shalt.err (!%p1791_p9)
}
  0x34   :  { %48 = dma.hbm_to_vmem [thread:$0]  %s2657_s2, 128, %s46_s21, [#allocation6]  }
  0x35   :  { %1839 = dma.done.wait [#allocation3], 2048  }
  0x36   :  { %1840 = vsyncadd [#allocation3], 4294965248 }
  0x37   :  { %1841 = dma.done.wait [#allocation6], 5248  }
  0x38   :  { %1842 = vsyncadd [#allocation6], 4294962048  ;;  %v1854_v0 = vmov 0   ;;  %v1673_v1 = vld [vmem:[#allocation5 + $0x4] ss:$20 sps:$4 sm:$0xff]   ;;  %v60_v34 = vld [vmem:[#allocation2 + $0x8] sm:$0xff]  ;;  %v903_v58 = vlaneseq }
  0x39   :  { %371 = vmatprep.mubr.bf16.mxu0 %v1854_v0  ;;  %484 = vmatprep.mubr.bf16.mxu1 %v1854_v0  ;;  %v1675_v2 = vld [vmem:[#allocation5 + $0xc] ss:$20 sps:$4 sm:$0xff]   ;;  %v1678_v4 = vld [vmem:[#allocation5 + $0x8] ss:$20 sps:$4 sm:$0xff]   ;;  %v1684_v8 = vld [vmem:[#allocation5 + $0x30] ss:$20 sps:$4 sm:$0xff]  }
  0x3a   :  { %339 = vmatprep.subr.bf16.mxu0 %v1673_v1  ;;  %v1677_v3 = vld [vmem:[#allocation5] ss:$20 sps:$4 sm:$0xff]   ;;  %452 = vmatprep.subr.bf16.mxu1 %v1675_v2  ;;  %v1683_v7 = vld [vmem:[#allocation5 + $0x28] ss:$20 sps:$4 sm:$0xff]   ;;  %v1689_v11 = vld [vmem:[#allocation5 + $0x50] ss:$20 sps:$4 sm:$0xff]  }
  0x3b   :  { %v1679_v5 = vld [vmem:[#allocation5 + $0x2c] ss:$20 sps:$4 sm:$0xff]   ;;  %340 = vmatpush1.bf16.msra.mxu0 %v1677_v3  ;;  %453 = vmatpush1.bf16.msra.mxu1 %v1678_v4  ;;  %v1681_v6 = vld [vmem:[#allocation5 + $0x34] ss:$20 sps:$4 sm:$0xff]   ;;  %v1687_v10 = vld [vmem:[#allocation5 + $0x5c] ss:$20 sps:$4 sm:$0xff]  }
  0x3c   :  { %341 = vmatprep.subr.bf16.mxu0 %v1679_v5  ;;  %454 = vmatprep.subr.bf16.mxu1 %v1681_v6  ;;  %v1685_v9 = vld [vmem:[#allocation5 + $0x54] ss:$20 sps:$4 sm:$0xff]   ;;  %v1690_v12 = vld [vmem:[#allocation5 + $0x58] ss:$20 sps:$4 sm:$0xff]   ;;  %v1691_v13 = vld [vmem:[#allocation5 + $0x7c] ss:$20 sps:$4 sm:$0xff]  }
  0x3d   :  { %v1693_v14 = vld [vmem:[#allocation5 + $0x84] ss:$20 sps:$4 sm:$0xff]   ;;  %v1696_v16 = vld [vmem:[#allocation5 + $0x80] ss:$20 sps:$4 sm:$0xff]   ;;  %v1702_v20 = vld [vmem:[#allocation5 + $0xa8] ss:$20 sps:$4 sm:$0xff]  }
  0x3e   :  { %v1695_v15 = vld [vmem:[#allocation5 + $0x78] ss:$20 sps:$4 sm:$0xff]   ;;  %v1701_v19 = vld [vmem:[#allocation5 + $0xa0] ss:$20 sps:$4 sm:$0xff]   ;;  %v1707_v23 = vld [vmem:[#allocation5 + $0xc8] ss:$20 sps:$4 sm:$0xff]  }
  0x3f   :  { %342 = vmatpush1.bf16.msra.mxu0 %v1683_v7  ;;  %455 = vmatpush1.bf16.msra.mxu1 %v1684_v8  ;;  %v1697_v17 = vld [vmem:[#allocation5 + $0xa4] ss:$20 sps:$4 sm:$0xff]   ;;  %v1699_v18 = vld [vmem:[#allocation5 + $0xac] ss:$20 sps:$4 sm:$0xff]   ;;  %v1705_v22 = vld [vmem:[#allocation5 + $0xd4] ss:$20 sps:$4 sm:$0xff]  }
  0x40   :  { %343 = vmatprep.subr.bf16.mxu0 %v1685_v9  ;;  %456 = vmatprep.subr.bf16.mxu1 %v1687_v10  ;;  %v1703_v21 = vld [vmem:[#allocation5 + $0xcc] ss:$20 sps:$4 sm:$0xff]   ;;  %v1708_v24 = vld [vmem:[#allocation5 + $0xd0] ss:$20 sps:$4 sm:$0xff]   ;;  %v1709_v25 = vld [vmem:[#allocation5 + $0xf4] ss:$20 sps:$4 sm:$0xff]  }
  0x41   :  { %v1711_v26 = vld [vmem:[#allocation5 + $0xfc] ss:$20 sps:$4 sm:$0xff]   ;;  %v1714_v28 = vld [vmem:[#allocation5 + $0xf8] ss:$20 sps:$4 sm:$0xff]   ;;  %v1720_v32 = vld [vmem:[#allocation5 + $0x120] ss:$20 sps:$4 sm:$0xff]  }
  0x42   :  { %v1713_v27 = vld [vmem:[#allocation5 + $0xf0] ss:$20 sps:$4 sm:$0xff]   ;;  %v1719_v31 = vld [vmem:[#allocation5 + $0x118] ss:$20 sps:$4 sm:$0xff]   ;;  %v1968_v59 = vshrl.u32 %v903_v58, 7  ;;  %vm1319_vm0 = vcmask 7168  }
  0x43   :  { %344 = vmatpush1.bf16.msra.mxu0 %v1689_v11  ;;  %457 = vmatpush1.bf16.msra.mxu1 %v1690_v12  ;;  %v1715_v29 = vld [vmem:[#allocation5 + $0x11c] ss:$20 sps:$4 sm:$0xff]   ;;  %v1717_v30 = vld [vmem:[#allocation5 + $0x124] ss:$20 sps:$4 sm:$0xff]   ;;  %v64_v40 = vld [vmem:[#allocation2 + $0x28] sm:$0xff]  ;;  %vm1336_vm1 = vcmask 15360  }
  0x44   :  { %345 = vmatprep.subr.bf16.mxu0 %v1691_v13  ;;  %458 = vmatprep.subr.bf16.mxu1 %v1693_v14  ;;  %v59_v33 = vld [vmem:[#allocation2] sm:$0xff]  ;;  %v61_v36 = vld [vmem:[#allocation2 + $0x10] sm:$0xff]  ;;  %v62_v37 = vld [vmem:[#allocation2 + $0x18] sm:$0xff]  ;;  %v905_v61 = vsub.s32 0, %v1968_v59  ;;  %v1113_v2 = vsub.s32 4, %v1968_v59  ;;  %vm1353_vm2 = vcmask 23552  }
  0x45   :  { %v75_v35 = vpack.c.bf16 %v60_v34, %v59_v33  ;;  %v1932_v38 = vpack.c.bf16 %v62_v37, %v61_v36  ;;  %v63_v39 = vld [vmem:[#allocation2 + $0x20] sm:$0xff]  ;;  %v65_v42 = vld [vmem:[#allocation2 + $0x30] sm:$0xff]  ;;  %v66_v43 = vld [vmem:[#allocation2 + $0x38] sm:$0xff]  ;;  %vm1370_vm3 = vcmask 31744   ;;  %vm1387_vm4 = vcmask 39936   ;;  %s1855_s22 = smov [#allocation8]  }
  0x46   :  { %v1938_v41 = vpack.c.bf16 %v64_v40, %v63_v39  ;;  %v1944_v44 = vpack.c.bf16 %v66_v43, %v65_v42  ;;  %v67_v45 = vld [vmem:[#allocation2 + $0x40] sm:$0xff]  ;;  %v68_v46 = vld [vmem:[#allocation2 + $0x48] sm:$0xff]  ;;  %v69_v48 = vld [vmem:[#allocation2 + $0x50] sm:$0xff]  ;;  %v1061_v43 = vsub.s32 3, %v1968_v59  ;;  %vm1404_vm5 = vcmask 48128   ;;  %s1460_s23 = sshll.u32 %s1855_s22, 4  ;;  %s1461_s23 = int_to_ptr.vmem [resolvable:$true] %s1460_s23 }
  0x47   :  { %346 = vmatpush1.bf16.msra.mxu0 %v1695_v15  ;;  %459 = vmatpush1.bf16.msra.mxu1 %v1696_v16  ;;  %v79_v47 = vpack.c.bf16 %v68_v46, %v67_v45  ;;  %v70_v49 = vld [vmem:[#allocation2 + $0x58] sm:$0xff]  ;;  %v71_v51 = vld [vmem:[#allocation2 + $0x60] sm:$0xff]  ;;  %v72_v52 = vld [vmem:[#allocation2 + $0x68] sm:$0xff]  ;;  %vm1421_vm6 = vcmask 56320   ;;  %vm1438_vm7 = vcmask 64512   ;;  %s1795_s24 = scalar_lea.vmem %s1461_s23, 4096  ;;  %p1800_p11 = scmp.lt.s32.totalorder %s1461_s23, %s1461_s23 }
  0x48   :  { %347 = vmatprep.subr.bf16.mxu0 %v1697_v17  ;;  %460 = vmatprep.subr.bf16.mxu1 %v1699_v18  ;;  %v1952_v50 = vpack.c.bf16 %v70_v49, %v69_v48  ;;  %v1958_v53 = vpack.c.bf16 %v72_v52, %v71_v51  ;;  %v73_v54 = vld [vmem:[#allocation2 + $0x70] sm:$0xff]  ;;  %v74_v55 = vld [vmem:[#allocation2 + $0x78] sm:$0xff]  ;;  %v1971_v62 = vld [vmem:[#allocation7] sm:$0xff]  ;;  %p1796_p10 = scmp.ne.s32.totalorder %s1461_s23, %s1795_s24  ;;  %p1801_p12 = scmp.lt.s32.totalorder %s1795_s24, %s1795_s24 }
  0x49   :  { %v1964_v56 = vpack.c.bf16 %v74_v55, %v73_v54  ;;  %v1721_v57 = vld [vmem:[#allocation5 + $0x10] ss:$20 sps:$4 sm:$0xff]   ;;  %v1722_v60 = vld [vmem:[#allocation5 + $0x38] ss:$20 sps:$4 sm:$0xff]   ;;  %v1974_v63 = vrot.slane %v1971_v62, %v905_v61  ;;  %v1723_v1 = vld [vmem:[#allocation5 + $0x60] ss:$20 sps:$4 sm:$0xff]   ;;  %v1996_v16 = vrot.slane %v1971_v62, %v1113_v2  ;;  %v2050_v52 = vrot.slane %v1971_v62, %v1061_v43 }
  0x4a   :  { %v1725_v45 = vld [vmem:[#allocation5 + $0xb0] ss:$20 sps:$4 sm:$0xff]   ;;  %p1802_p13 = por %p1801_p12, %p1800_p11 }
  0x4b   :  { %348 = vmatpush1.bf16.msra.mxu0 %v1701_v19  ;;  %461 = vmatpush1.bf16.msra.mxu1 %v1702_v20  ;;  %v1217_v20 = vsub.s32 6, %v1968_v59 }
  0x4c   :  { %349 = vmatprep.subr.bf16.mxu0 %v1703_v21  ;;  %462 = vmatprep.subr.bf16.mxu1 %v1705_v22  ;;  %v1724_v21 = vld [vmem:[#allocation5 + $0x88] ss:$20 sps:$4 sm:$0xff]   ;;  %p1803_p0 = pnand %p1802_p13, %p1796_p10 }
  0x4f   :  { %350 = vmatpush1.bf16.msra.mxu0 %v1707_v23  ;;  %463 = vmatpush1.bf16.msra.mxu1 %v1708_v24  ;;  %v957_v23 = vsub.s32 1, %v1968_v59 }
  0x50   :  { %351 = vmatprep.subr.bf16.mxu0 %v1709_v25  ;;  %464 = vmatprep.subr.bf16.mxu1 %v1711_v26 }
  0x53   :  { %352 = vmatpush1.bf16.msra.mxu0 %v1713_v27  ;;  %465 = vmatpush1.bf16.msra.mxu1 %v1714_v28  ;;  %v2012_v27 = vrot.slane %v1971_v62, %v1217_v20 }
  0x54   :  { %353 = vmatprep.subr.bf16.mxu0 %v1715_v29  ;;  %466 = vmatprep.subr.bf16.mxu1 %v1717_v30 }
  0x57   :  { %354 = vmatpush1.bf16.msra.mxu0 %v1719_v31  ;;  %467 = vmatpush1.bf16.msra.mxu1 %v1720_v32 }
  0x58   :  { %1613 = vmatprep.subr.bf16.mxu0 %v1721_v57  ;;  %1645 = vmatprep.subr.bf16.mxu1 %v1721_v57 }
  0x5a   :  { %372 = vmatmul.mubr.bf16.vlgmr.msra.gmra.mrb[0].mxu0 %v75_v35  ;;  %485 = vmatmul.mubr.bf16.vlgmr.msra.gmra.mrb[0].mxu1 %v75_v35 }
  0x5b   :  { %381 = vmatprep.mubr.bf16.mxu0 %v1854_v0  ;;  %494 = vmatprep.mubr.bf16.mxu1 %v1854_v0 }
  0x5c   :  { %1614 = vmatpush3.bf16.msra.mxu0 %v1721_v57  ;;  %1653 = vmatpush3.bf16.msra.mxu1 %v1721_v57 }
  0x5d   :  { %1615 = vmatprep.subr.bf16.mxu0 %v1722_v60  ;;  %1646 = vmatprep.subr.bf16.mxu1 %v1722_v60 }
  0x60   :  { %1616 = vmatpush3.bf16.msra.mxu0 %v1722_v60  ;;  %1654 = vmatpush3.bf16.msra.mxu1 %v1722_v60 }
  0x61   :  { %1617 = vmatprep.subr.bf16.mxu0 %v1723_v1  ;;  %1647 = vmatprep.subr.bf16.mxu1 %v1723_v1 }
  0x62   :  { %382 = vmatmul.mubr.bf16.gmra.mrb[4].mxu0 %v1932_v38  ;;  %495 = vmatmul.mubr.bf16.gmra.mrb[4].mxu1 %v1932_v38 }
  0x63   :  { %391 = vmatprep.mubr.bf16.mxu0 %v1854_v0  ;;  %504 = vmatprep.mubr.bf16.mxu1 %v1854_v0 }
  0x64   :  { %1618 = vmatpush3.bf16.msra.mxu0 %v1723_v1  ;;  %1655 = vmatpush3.bf16.msra.mxu1 %v1723_v1 }
  0x65   :  { %1619 = vmatprep.subr.bf16.mxu0 %v1724_v21  ;;  %1648 = vmatprep.subr.bf16.mxu1 %v1724_v21 }
  0x68   :  { %1620 = vmatpush3.bf16.msra.mxu0 %v1724_v21  ;;  %1656 = vmatpush3.bf16.msra.mxu1 %v1724_v21 }
  0x69   :  { %1621 = vmatprep.subr.bf16.mxu0 %v1725_v45  ;;  %1649 = vmatprep.subr.bf16.mxu1 %v1725_v45 }
  0x6a   :  { %392 = vmatmul.mubr.bf16.gmra.mrb[8].mxu0 %v1938_v41  ;;  %505 = vmatmul.mubr.bf16.gmra.mrb[8].mxu1 %v1938_v41 }
  0x6b   :  { %401 = vmatprep.mubr.bf16.mxu0 %v1854_v0  ;;  %514 = vmatprep.mubr.bf16.mxu1 %v1854_v0 }
  0x6c   :  { %1622 = vmatpush3.bf16.msra.mxu0 %v1725_v45  ;;  %1657 = vmatpush3.bf16.msra.mxu1 %v1725_v45 }
  0x72   :  { %402 = vmatmul.mubr.bf16.gmra.mrb[12].mxu0 %v1944_v44  ;;  %515 = vmatmul.mubr.bf16.gmra.mrb[12].mxu1 %v1944_v44 }
  0x73   :  { %411 = vmatprep.mubr.bf16.mxu0 %v1854_v0  ;;  %524 = vmatprep.mubr.bf16.mxu1 %v1854_v0 }
  0x7a   :  { %412 = vmatmul.mubr.bf16.gmra.mrb[16].mxu0 %v79_v47  ;;  %525 = vmatmul.mubr.bf16.gmra.mrb[16].mxu1 %v79_v47 }
  0x7b   :  { %421 = vmatprep.mubr.bf16.mxu0 %v1854_v0  ;;  %534 = vmatprep.mubr.bf16.mxu1 %v1854_v0 }
  0x82   :  { %422 = vmatmul.mubr.bf16.gmra.mrb[20].mxu0 %v1952_v50  ;;  %535 = vmatmul.mubr.bf16.gmra.mrb[20].mxu1 %v1952_v50 }
  0x83   :  { %431 = vmatprep.mubr.bf16.mxu0 %v1854_v0  ;;  %544 = vmatprep.mubr.bf16.mxu1 %v1854_v0 }
  0x8a   :  { %432 = vmatmul.mubr.bf16.gmra.mrb[24].mxu0 %v1958_v53  ;;  %545 = vmatmul.mubr.bf16.gmra.mrb[24].mxu1 %v1958_v53 }
  0x8b   :  { %441 = vmatprep.mubr.bf16.mxu0 %v1854_v0  ;;  %554 = vmatprep.mubr.bf16.mxu1 %v1854_v0  ;;  %v1009_v0 = vsub.s32 2, %v1968_v59 }
  0x8d   :  { %v1984_v8 = vrot.slane %v1971_v62, %v1009_v0 }
  0x92   :  { %442 = vmatmul.mubr.bf16.gmra.mrb[28].mxu0 %v1964_v56  ;;  %555 = vmatmul.mubr.bf16.gmra.mrb[28].mxu1 %v1964_v56 }
  0x93   :  { %1629 = vmatprep.mubr.bf16.mxu0 %v75_v35  ;;  %1637 = vmatprep.mubr.bf16.mxu1 %v79_v47  ;;  %v2028_v35 = vrot.slane %v1971_v62, %v957_v23  ;;  %v1165_v47 = vsub.s32 5, %v1968_v59 }
  0x95   :  { %v2067_v1 = vrot.slane %v1971_v62, %v1165_v47 }
 0x12d   :  { %v373_v3 = vpop.f32.mrb[0].mxu0  ;;  %v486_v4 = vpop.f32.mrb[0].mxu1 }
 0x12e   :  { %v1978_v5 = vpop.f32.mrb[1].mxu0  ;;  %v1980_v6 = vpop.f32.mrb[1].mxu1  ;;  %v907_v7 = vmul.f32 %v1974_v63, %v373_v3  ;;  %v1011_v19 = vmul.f32 %v1984_v8, %v486_v4  ;;  %v1115_v26 = vmul.f32 %v1996_v16, %v373_v3  ;;  %v1219_v42 = vmul.f32 %v2012_v27, %v486_v4 }
 0x12f   :  { %v1565_v9 = vpack.c.bf16 %v1978_v5, %v373_v3  ;;  %v1566_v10 = vpack.c.bf16 %v1980_v6, %v486_v4  ;;  %v1988_v11 = vpop.f32.mrb[2].mxu0  ;;  %v490_v12 = vpop.f32.mrb[2].mxu1  ;;  %v959_v51 = vmul.f32 %v2028_v35, %v1978_v5 }
 0x130   :  { %v1990_v13 = vpop.f32.mrb[3].mxu1  ;;  %923 = vadd.xlane.f32.xlu0 %v907_v7  ;;  %v1992_v14 = vpop.f32.mrb[3].mxu0  ;;  %v1012_v15 = vmul.f32 %v1984_v8, %v490_v12  ;;  %v1116_v22 = vmul.f32 %v1996_v16, %v1988_v11  ;;  %v1220_v34 = vmul.f32 %v2012_v27, %v490_v12  ;;  %v908_v45 = vmul.f32 %v1974_v63, %v1988_v11 }
 0x131   :  { %854 = vst [vmem:[#allocation8] sm:$0xff] %v1565_v9  ;;  %855 = vst [vmem:[#allocation8 + $0x8] sm:$0xff] %v1566_v10  ;;  %v1568_v17 = vpack.c.bf16 %v1990_v13, %v490_v12  ;;  %v1567_v18 = vpack.c.bf16 %v1992_v14, %v1988_v11  ;;  %v960_v46 = vmul.f32 %v2028_v35, %v1992_v14  ;;  %v1269_v10 = vsub.s32 7, %v1968_v59  ;;  %v1726_v12 = vld [vmem:[#allocation5 + $0xd8] ss:$20 sps:$4 sm:$0xff]  }
 0x132   :  { %1029 = vadd.xlane.f32.xlu1 %v1012_v15  ;;  %v1064_v0 = vmul.f32 %v2050_v52, %v1990_v13  ;;  %v1063_v9 = vmul.f32 %v2050_v52, %v1980_v6  ;;  %v1168_v15 = vmul.f32 %v2067_v1, %v1992_v14  ;;  %1623 = vmatprep.subr.bf16.mxu0 %v1726_v12 }
 0x133   :  { %857 = vst [vmem:[#allocation8 + $0x18] sm:$0xff] %v1568_v17  ;;  %856 = vst [vmem:[#allocation8 + $0x10] sm:$0xff] %v1567_v18  ;;  %1650 = vmatprep.subr.bf16.mxu1 %v1726_v12  ;;  %v2089_v20 = vrot.slane %v1971_v62, %v1269_v10  ;;  %1624 = vmatpush3.bf16.msra.mxu0 %v1726_v12 }
 0x134   :  { %1027 = vadd.xlane.f32.xlu0 %v1011_v19  ;;  %v1167_v19 = vmul.f32 %v2067_v1, %v1978_v5  ;;  %1658 = vmatpush3.bf16.msra.mxu1 %v1726_v12  ;;  %v1728_v12 = vld [vmem:[#allocation5 + $0x128] ss:$20 sps:$4 sm:$0xff]  }
 0x135   :  { %v2006_v24 = vpop.f32.mrb[4].mxu0  ;;  %v2008_v25 = vpop.f32.mrb[4].mxu1  ;;  %v1272_v62 = vmul.f32 %v2089_v20, %v1990_v13 }
 0x136   :  { %1133 = vadd.xlane.f32.xlu1 %v1116_v22  ;;  %v2014_v28 = vpop.f32.mrb[5].mxu0  ;;  %v2016_v29 = vpop.f32.mrb[5].mxu1  ;;  %v909_v13 = vmul.f32 %v1974_v63, %v2006_v24  ;;  %v1013_v11 = vmul.f32 %v1984_v8, %v2008_v25 }
 0x137   :  { %v1569_v30 = vpack.c.bf16 %v2014_v28, %v2006_v24  ;;  %v2020_v31 = vpop.f32.mrb[6].mxu0  ;;  %v1570_v32 = vpack.c.bf16 %v2016_v29, %v2008_v25  ;;  %v2024_v33 = vpop.f32.mrb[6].mxu1 }
 0x138   :  { %1131 = vadd.xlane.f32.xlu0 %v1115_v26  ;;  %v2030_v36 = vpop.f32.mrb[7].mxu0  ;;  %v2032_v37 = vpop.f32.mrb[7].mxu1 }
 0x139   :  { %858 = vst [vmem:[#allocation8 + $0x20] sm:$0xff] %v1569_v30  ;;  %v1571_v39 = vpack.c.bf16 %v2030_v36, %v2020_v31  ;;  %859 = vst [vmem:[#allocation8 + $0x28] sm:$0xff] %v1570_v32  ;;  %v1572_v40 = vpack.c.bf16 %v2032_v37, %v2024_v33 }
 0x13a   :  { %1237 = vadd.xlane.f32.xlu1 %v1220_v34 }
 0x13b   :  { %860 = vst [vmem:[#allocation8 + $0x30] sm:$0xff] %v1571_v39  ;;  %861 = vst [vmem:[#allocation8 + $0x38] sm:$0xff] %v1572_v40  ;;  %v1271_v39 = vmul.f32 %v2089_v20, %v1980_v6  ;;  %v1727_v40 = vld [vmem:[#allocation5 + $0x100] ss:$20 sps:$4 sm:$0xff]  }
 0x13c   :  { %1235 = vadd.xlane.f32.xlu0 %v1219_v42  ;;  %1625 = vmatprep.subr.bf16.mxu0 %v1727_v40 }
 0x13d   :  { %v2043_v48 = vpop.f32.mrb[8].mxu0  ;;  %v2045_v49 = vpop.f32.mrb[8].mxu1  ;;  %1651 = vmatprep.subr.bf16.mxu1 %v1727_v40  ;;  %1626 = vmatpush3.bf16.msra.mxu0 %v1727_v40 }
 0x13e   :  { %977 = vadd.xlane.f32.xlu1 %v960_v46  ;;  %v2052_v54 = vpop.f32.mrb[9].mxu0  ;;  %v2054_v55 = vpop.f32.mrb[9].mxu1  ;;  %1659 = vmatpush3.bf16.msra.mxu1 %v1727_v40 }
 0x13f   :  { %v1573_v57 = vpack.c.bf16 %v2052_v54, %v2043_v48  ;;  %v2058_v58 = vpop.f32.mrb[10].mxu0  ;;  %v1574_v60 = vpack.c.bf16 %v2054_v55, %v2045_v49  ;;  %v2062_v61 = vpop.f32.mrb[10].mxu1  ;;  %1627 = vmatprep.subr.bf16.mxu0 %v1728_v12  ;;  %1652 = vmatprep.subr.bf16.mxu1 %v1728_v12 }
 0x140   :  { %975 = vadd.xlane.f32.xlu0 %v959_v51  ;;  %v2069_v2 = vpop.f32.mrb[11].mxu0  ;;  %v2071_v3 = vpop.f32.mrb[11].mxu1 }
 0x141   :  { %862 = vst [vmem:[#allocation8 + $0x40] sm:$0xff] %v1573_v57  ;;  %v1575_v4 = vpack.c.bf16 %v2069_v2, %v2058_v58  ;;  %863 = vst [vmem:[#allocation8 + $0x48] sm:$0xff] %v1574_v60  ;;  %v1576_v7 = vpack.c.bf16 %v2071_v3, %v2062_v61  ;;  %1628 = vmatpush3.bf16.msra.mxu0 %v1728_v12 }
 0x142   :  { %1081 = vadd.xlane.f32.xlu1 %v1064_v0  ;;  %v910_v0 = vmul.f32 %v1974_v63, %v2020_v31  ;;  %1660 = vmatpush3.bf16.msra.mxu1 %v1728_v12  ;;  %v911_v12 = vmul.f32 %v1974_v63, %v2043_v48 }
 0x143   :  { %864 = vst [vmem:[#allocation8 + $0x50] sm:$0xff] %v1575_v4  ;;  %865 = vst [vmem:[#allocation8 + $0x58] sm:$0xff] %v1576_v7 }
 0x144   :  { %1079 = vadd.xlane.f32.xlu0 %v1063_v9  ;;  %1630 = vmatmul.mubr.bf16.vlgmr.msra.gmra.mrb[32].mxu0 %v1932_v38  ;;  %v961_v38 = vmul.f32 %v2028_v35, %v2014_v28 }
 0x145   :  { %v2082_v17 = vpop.f32.mrb[12].mxu0  ;;  %v2084_v18 = vpop.f32.mrb[12].mxu1  ;;  %1638 = vmatmul.mubr.bf16.vlgmr.msra.gmra.mrb[32].mxu1 %v1952_v50  ;;  %1633 = vmatprep.mubr.bf16.mxu0 %v1938_v41  ;;  %v1065_v41 = vmul.f32 %v2050_v52, %v2016_v29  ;;  %v1066_v50 = vmul.f32 %v2050_v52, %v2032_v37 }
 0x146   :  { %1185 = vadd.xlane.f32.xlu1 %v1168_v15  ;;  %v2091_v59 = vpop.f32.mrb[13].mxu0  ;;  %v2093_v21 = vpop.f32.mrb[13].mxu1  ;;  %v1014_v15 = vmul.f32 %v1984_v8, %v2024_v33  ;;  %1641 = vmatprep.mubr.bf16.mxu1 %v1958_v53  ;;  %v1169_v53 = vmul.f32 %v2067_v1, %v2014_v28 }
 0x147   :  { %v1577_v14 = vpack.c.bf16 %v2091_v59, %v2082_v17  ;;  %v2097_v22 = vpop.f32.mrb[14].mxu0  ;;  %v1578_v23 = vpack.c.bf16 %v2093_v21, %v2084_v18  ;;  %v2101_v26 = vpop.f32.mrb[14].mxu1 }
 0x148   :  { %1183 = vadd.xlane.f32.xlu0 %v1167_v19  ;;  %v2105_v5 = vpop.f32.mrb[15].mxu0  ;;  %v2107_v30 = vpop.f32.mrb[15].mxu1 }
 0x149   :  { %866 = vst [vmem:[#allocation8 + $0x60] sm:$0xff] %v1577_v14  ;;  %v1579_v32 = vpack.c.bf16 %v2105_v5, %v2097_v22  ;;  %867 = vst [vmem:[#allocation8 + $0x68] sm:$0xff] %v1578_v23  ;;  %v1580_v34 = vpack.c.bf16 %v2107_v30, %v2101_v26  ;;  %v1117_v23 = vmul.f32 %v1996_v16, %v2006_v24 }
 0x14a   :  { %1289 = vadd.xlane.f32.xlu1 %v1272_v62  ;;  %v1118_v24 = vmul.f32 %v1996_v16, %v2020_v31  ;;  %v1222_v31 = vmul.f32 %v2012_v27, %v2024_v33  ;;  %v1170_v33 = vmul.f32 %v2067_v1, %v2030_v36 }
 0x14b   :  { %868 = vst [vmem:[#allocation8 + $0x70] sm:$0xff] %v1579_v32  ;;  %869 = vst [vmem:[#allocation8 + $0x78] sm:$0xff] %v1580_v34 }
 0x14c   :  { %1287 = vadd.xlane.f32.xlu0 %v1271_v39  ;;  %1634 = vmatmul.mubr.bf16.gmra.mrb[36].mxu0 %v1944_v44  ;;  %v1273_v44 = vmul.f32 %v2089_v20, %v2016_v29 }
 0x14d   :  { %v2117_v42 = vpop.f32.mrb[16].mxu0  ;;  %v2119_v43 = vpop.f32.mrb[16].mxu1  ;;  %1642 = vmatmul.mubr.bf16.gmra.mrb[36].mxu1 %v1964_v56  ;;  %v1274_v56 = vmul.f32 %v2089_v20, %v2032_v37  ;;  %v912_v37 = vmul.f32 %v1974_v63, %v2058_v58 }
 0x14e   :  { %927 = vadd.xlane.f32.xlu1 %v909_v13  ;;  %v2123_v46 = vpop.f32.mrb[17].mxu0  ;;  %v2125_v6 = vpop.f32.mrb[17].mxu1 }
 0x14f   :  { %v1581_v47 = vpack.c.bf16 %v2123_v46, %v2117_v42  ;;  %v2129_v51 = vpop.f32.mrb[18].mxu0  ;;  %v1582_v57 = vpack.c.bf16 %v2125_v6, %v2119_v43  ;;  %v2133_v60 = vpop.f32.mrb[18].mxu1 }
 0x150   :  { %925 = vadd.xlane.f32.xlu0 %v908_v45  ;;  %v2139_v4 = vpop.f32.mrb[19].mxu0  ;;  %v2141_v7 = vpop.f32.mrb[19].mxu1 }
 0x151   :  { %870 = vst [vmem:[#allocation8 + $0x80] sm:$0xff] %v1581_v47  ;;  %v1583_v9 = vpack.c.bf16 %v2139_v4, %v2129_v51  ;;  %871 = vst [vmem:[#allocation8 + $0x88] sm:$0xff] %v1582_v57  ;;  %v1584_v10 = vpack.c.bf16 %v2141_v7, %v2133_v60 }
 0x152   :  { %929 = vadd.xlane.f32.xlu1 %v910_v0 }
 0x153   :  { %872 = vst [vmem:[#allocation8 + $0x90] sm:$0xff] %v1583_v9  ;;  %873 = vst [vmem:[#allocation8 + $0x98] sm:$0xff] %v1584_v10 }
 0x154   :  { %1031 = vadd.xlane.f32.xlu0 %v1013_v11  ;;  %v1221_v11 = vmul.f32 %v2012_v27, %v2008_v25  ;;  %v962_v25 = vmul.f32 %v2028_v35, %v2030_v36 }
 0x155   :  { %v2149_v19 = vpop.f32.mrb[20].mxu0  ;;  %v2151_v14 = vpop.f32.mrb[20].mxu1 }
 0x156   :  { %1033 = vadd.xlane.f32.xlu1 %v1014_v15  ;;  %v2155_v62 = vpop.f32.mrb[21].mxu0  ;;  %v2157_v32 = vpop.f32.mrb[21].mxu1 }
 0x157   :  { %v1585_v34 = vpack.c.bf16 %v2155_v62, %v2149_v19  ;;  %v2161_v39 = vpop.f32.mrb[22].mxu0  ;;  %v1586_v13 = vpack.c.bf16 %v2157_v32, %v2151_v14  ;;  %v2165_v40 = vpop.f32.mrb[22].mxu1 }
 0x158   :  { %1135 = vadd.xlane.f32.xlu0 %v1117_v23  ;;  %v2169_v45 = vpop.f32.mrb[23].mxu0  ;;  %v2171_v47 = vpop.f32.mrb[23].mxu1 }
 0x159   :  { %874 = vst [vmem:[#allocation8 + $0xa0] sm:$0xff] %v1585_v34  ;;  %v1587_v57 = vpack.c.bf16 %v2169_v45, %v2161_v39  ;;  %875 = vst [vmem:[#allocation8 + $0xa8] sm:$0xff] %v1586_v13  ;;  %v1588_v0 = vpack.c.bf16 %v2171_v47, %v2165_v40  ;;  %v1015_v13 = vmul.f32 %v1984_v8, %v2045_v49 }
 0x15a   :  { %1137 = vadd.xlane.f32.xlu1 %v1118_v24 }
 0x15b   :  { %876 = vst [vmem:[#allocation8 + $0xb0] sm:$0xff] %v1587_v57  ;;  %877 = vst [vmem:[#allocation8 + $0xb8] sm:$0xff] %v1588_v0 }
 0x15c   :  { %1239 = vadd.xlane.f32.xlu0 %v1221_v11 }
 0x15d   :  { %v2201_v9 = vpop.f32.mrb[24].mxu0  ;;  %v2215_v29 = vpop.f32.mrb[24].mxu1 }
 0x15e   :  { %1241 = vadd.xlane.f32.xlu1 %v1222_v31  ;;  %v2203_v10 = vpop.f32.mrb[25].mxu0  ;;  %v2219_v34 = vpop.f32.mrb[25].mxu1  ;;  %v1016_v31 = vmul.f32 %v1984_v8, %v2062_v61 }
 0x15f   :  { %v1589_v28 = vpack.c.bf16 %v2203_v10, %v2201_v9  ;;  %v2211_v15 = vpop.f32.mrb[26].mxu0  ;;  %v1590_v24 = vpack.c.bf16 %v2219_v34, %v2215_v29  ;;  %v2227_v57 = vpop.f32.mrb[26].mxu1 }
 0x160   :  { %979 = vadd.xlane.f32.xlu0 %v961_v38  ;;  %v2213_v36 = vpop.f32.mrb[27].mxu0  ;;  %v2229_v0 = vpop.f32.mrb[27].mxu1  ;;  %v1119_v38 = vmul.f32 %v1996_v16, %v2043_v48  ;;  %v964_v48 = vmul.f32 %v2028_v35, %v2069_v2 }
 0x161   :  { %878 = vst [vmem:[#allocation8 + $0xc0] sm:$0xff] %v1589_v28  ;;  %v1591_v23 = vpack.c.bf16 %v2213_v36, %v2211_v15  ;;  %879 = vst [vmem:[#allocation8 + $0xc8] sm:$0xff] %v1590_v24  ;;  %v1592_v11 = vpack.c.bf16 %v2229_v0, %v2227_v57  ;;  %v1276_v28 = vmul.f32 %v2089_v20, %v2071_v3 }
 0x162   :  { %981 = vadd.xlane.f32.xlu1 %v962_v25  ;;  %v1120_v25 = vmul.f32 %v1996_v16, %v2058_v58  ;;  %v1067_v58 = vmul.f32 %v2050_v52, %v2054_v55 }
 0x163   :  { %880 = vst [vmem:[#allocation8 + $0xd0] sm:$0xff] %v1591_v23  ;;  %881 = vst [vmem:[#allocation8 + $0xd8] sm:$0xff] %v1592_v11  ;;  %v913_v23 = vmul.f32 %v1974_v63, %v2082_v17  ;;  %v1017_v11 = vmul.f32 %v1984_v8, %v2084_v18 }
 0x164   :  { %1083 = vadd.xlane.f32.xlu0 %v1065_v41  ;;  %v1223_v41 = vmul.f32 %v2012_v27, %v2045_v49  ;;  %v1068_v49 = vmul.f32 %v2050_v52, %v2071_v3  ;;  %v914_v3 = vmul.f32 %v1974_v63, %v2097_v22 }
 0x166   :  { %1085 = vadd.xlane.f32.xlu1 %v1066_v50  ;;  %v1224_v50 = vmul.f32 %v2012_v27, %v2062_v61  ;;  %v1171_v61 = vmul.f32 %v2067_v1, %v2052_v54 }
 0x168   :  { %1187 = vadd.xlane.f32.xlu0 %v1169_v53  ;;  %v963_v53 = vmul.f32 %v2028_v35, %v2052_v54 }
 0x16a   :  { %1189 = vadd.xlane.f32.xlu1 %v1170_v33  ;;  %v1172_v33 = vmul.f32 %v2067_v1, %v2069_v2 }
 0x16c   :  { %1291 = vadd.xlane.f32.xlu0 %v1273_v44  ;;  %v1275_v44 = vmul.f32 %v2089_v20, %v2054_v55  ;;  %v2271_v55 = vpop.f32.mrb[28].mxu1 }
 0x16d   :  { %v2275_v24 = vpop.f32.mrb[29].mxu1 }
 0x16e   :  { %1293 = vadd.xlane.f32.xlu1 %v1274_v56  ;;  %v2257_v56 = vpop.f32.mrb[28].mxu0 }
 0x170   :  { %931 = vadd.xlane.f32.xlu0 %v911_v12  ;;  %v2259_v12 = vpop.f32.mrb[29].mxu0 }
 0x171   :  { %v1593_v54 = vpack.c.bf16 %v2259_v12, %v2257_v56 }
 0x172   :  { %933 = vadd.xlane.f32.xlu1 %v912_v37  ;;  %v2267_v37 = vpop.f32.mrb[30].mxu0 }
 0x173   :  { %882 = vst [vmem:[#allocation8 + $0xe0] sm:$0xff] %v1593_v54  ;;  %v2269_v2 = vpop.f32.mrb[31].mxu0  ;;  %v1019_v54 = vmul.f32 %v1984_v8, %v2119_v43 }
 0x174   :  { %1035 = vadd.xlane.f32.xlu0 %v1015_v13  ;;  %v1595_v13 = vpack.c.bf16 %v2269_v2, %v2267_v37 }
 0x176   :  { %1037 = vadd.xlane.f32.xlu1 %v1016_v31  ;;  %v1594_v31 = vpack.c.bf16 %v2275_v24, %v2271_v55  ;;  %884 = vst [vmem:[#allocation8 + $0xf0] sm:$0xff] %v1595_v13  ;;  %v1227_v13 = vmul.f32 %v2012_v27, %v2119_v43  ;;  %v1071_v43 = vmul.f32 %v2050_v52, %v2125_v6 }
 0x178   :  { %1139 = vadd.xlane.f32.xlu0 %v1119_v38  ;;  %v2283_v38 = vpop.f32.mrb[30].mxu1  ;;  %883 = vst [vmem:[#allocation8 + $0xe8] sm:$0xff] %v1594_v31  ;;  %v967_v31 = vmul.f32 %v2028_v35, %v2123_v46 }
 0x17a   :  { %1141 = vadd.xlane.f32.xlu1 %v1120_v25  ;;  %v2285_v25 = vpop.f32.mrb[31].mxu1 }
 0x17c   :  { %1243 = vadd.xlane.f32.xlu0 %v1223_v41  ;;  %v1596_v41 = vpack.c.bf16 %v2285_v25, %v2283_v38 }
 0x17e   :  { %1245 = vadd.xlane.f32.xlu1 %v1224_v50  ;;  %v1018_v50 = vmul.f32 %v1984_v8, %v2101_v26  ;;  %885 = vst [vmem:[#allocation8 + $0xf8] sm:$0xff] %v1596_v41 }
 0x180   :  { %983 = vadd.xlane.f32.xlu0 %v963_v53  ;;  %v1121_v53 = vmul.f32 %v1996_v16, %v2082_v17  ;;  %v966_v17 = vmul.f32 %v2028_v35, %v2105_v5 }
 0x182   :  { %985 = vadd.xlane.f32.xlu1 %v964_v48  ;;  %v1122_v48 = vmul.f32 %v1996_v16, %v2097_v22  ;;  %v1069_v22 = vmul.f32 %v2050_v52, %v2093_v21 }
 0x184   :  { %1087 = vadd.xlane.f32.xlu0 %v1067_v58  ;;  %v1225_v58 = vmul.f32 %v2012_v27, %v2084_v18  ;;  %v1070_v18 = vmul.f32 %v2050_v52, %v2107_v30 }
 0x186   :  { %1089 = vadd.xlane.f32.xlu1 %v1068_v49  ;;  %v1226_v49 = vmul.f32 %v2012_v27, %v2101_v26  ;;  %v1173_v26 = vmul.f32 %v2067_v1, %v2091_v59 }
 0x188   :  { %1191 = vadd.xlane.f32.xlu0 %v1171_v61  ;;  %v965_v61 = vmul.f32 %v2028_v35, %v2091_v59  ;;  %v916_v59 = vmul.f32 %v1974_v63, %v2129_v51 }
 0x18a   :  { %1193 = vadd.xlane.f32.xlu1 %v1172_v33  ;;  %v1174_v33 = vmul.f32 %v2067_v1, %v2105_v5  ;;  %v1123_v5 = vmul.f32 %v1996_v16, %v2117_v42 }
 0x18c   :  { %1295 = vadd.xlane.f32.xlu0 %v1275_v44  ;;  %v1277_v44 = vmul.f32 %v2089_v20, %v2093_v21  ;;  %v1020_v21 = vmul.f32 %v1984_v8, %v2133_v60 }
 0x18e   :  { %1297 = vadd.xlane.f32.xlu1 %v1276_v28  ;;  %v1278_v28 = vmul.f32 %v2089_v20, %v2107_v30  ;;  %v1124_v30 = vmul.f32 %v1996_v16, %v2129_v51 }
 0x190   :  { %935 = vadd.xlane.f32.xlu0 %v913_v23  ;;  %v915_v23 = vmul.f32 %v1974_v63, %v2117_v42  ;;  %v968_v42 = vmul.f32 %v2028_v35, %v2139_v4 }
 0x192   :  { %937 = vadd.xlane.f32.xlu1 %v914_v3  ;;  %v1228_v3 = vmul.f32 %v2012_v27, %v2133_v60  ;;  %v1072_v60 = vmul.f32 %v2050_v52, %v2141_v7 }
 0x194   :  { %1039 = vadd.xlane.f32.xlu0 %v1017_v11 }
 0x196   :  { %1041 = vadd.xlane.f32.xlu1 %v1018_v50 }
 0x198   :  { %1143 = vadd.xlane.f32.xlu0 %v1121_v53 }
 0x19a   :  { %1145 = vadd.xlane.f32.xlu1 %v1122_v48  ;;  %v1175_v48 = vmul.f32 %v2067_v1, %v2123_v46  ;;  %v917_v46 = vmul.f32 %v1974_v63, %v2149_v19 }
 0x19c   :  { %1247 = vadd.xlane.f32.xlu0 %v1225_v58 }
 0x19e   :  { %1249 = vadd.xlane.f32.xlu1 %v1226_v49  ;;  %v1176_v49 = vmul.f32 %v2067_v1, %v2139_v4 }
 0x1a0   :  { %987 = vadd.xlane.f32.xlu0 %v965_v61 }
 0x1a2   :  { %989 = vadd.xlane.f32.xlu1 %v966_v17  ;;  %v1279_v17 = vmul.f32 %v2089_v20, %v2125_v6  ;;  %v918_v6 = vmul.f32 %v1974_v63, %v2161_v39 }
 0x1a4   :  { %1091 = vadd.xlane.f32.xlu0 %v1069_v22 }
 0x1a6   :  { %1093 = vadd.xlane.f32.xlu1 %v1070_v18  ;;  %v1280_v18 = vmul.f32 %v2089_v20, %v2141_v7 }
 0x1a8   :  { %1195 = vadd.xlane.f32.xlu0 %v1173_v26 }
 0x1aa   :  { %1197 = vadd.xlane.f32.xlu1 %v1174_v33 }
 0x1ac   :  { %1299 = vadd.xlane.f32.xlu0 %v1277_v44  ;;  %v1021_v44 = vmul.f32 %v1984_v8, %v2151_v14 }
 0x1ae   :  { %1301 = vadd.xlane.f32.xlu1 %v1278_v28 }
 0x1b0   :  { %939 = vadd.xlane.f32.xlu0 %v915_v23 }
 0x1b2   :  { %941 = vadd.xlane.f32.xlu1 %v916_v59 }
 0x1b4   :  { %1043 = vadd.xlane.f32.xlu0 %v1019_v54  ;;  %v1022_v54 = vmul.f32 %v1984_v8, %v2165_v40 }
 0x1b6   :  { %1045 = vadd.xlane.f32.xlu1 %v1020_v21 }
 0x1b8   :  { %1147 = vadd.xlane.f32.xlu0 %v1123_v5 }
 0x1ba   :  { %1149 = vadd.xlane.f32.xlu1 %v1124_v30 }
 0x1bc   :  { %1251 = vadd.xlane.f32.xlu0 %v1227_v13  ;;  %v1125_v13 = vmul.f32 %v1996_v16, %v2149_v19 }
 0x1bd   :  { %v924_v11 = vpop.xlane.xlu0 %923 }
 0x1be   :  { %1253 = vadd.xlane.f32.xlu1 %v1228_v3 }
 0x1bf   :  { %v2333_v41 = vpop.xlane.xlu1 %1029 }
 0x1c0   :  { %991 = vadd.xlane.f32.xlu0 %v967_v31 }
 0x1c1   :  { %v1028_v51 = vpop.xlane.xlu0 %1027 }
 0x1c2   :  { %993 = vadd.xlane.f32.xlu1 %v968_v42 }
 0x1c3   :  { %v2339_v50 = vpop.xlane.xlu1 %1133 }
 0x1c4   :  { %1095 = vadd.xlane.f32.xlu0 %v1071_v43  ;;  %v1229_v43 = vmul.f32 %v2012_v27, %v2151_v14 }
 0x1c5   :  { %v1132_v53 = vpop.xlane.xlu0 %1131 }
 0x1c6   :  { %1097 = vadd.xlane.f32.xlu1 %v1072_v60  ;;  %v1230_v60 = vmul.f32 %v2012_v27, %v2165_v40 }
 0x1c7   :  { %v2345_v58 = vpop.xlane.xlu1 %1237 }
 0x1c8   :  { %1199 = vadd.xlane.f32.xlu0 %v1175_v48  ;;  %v969_v48 = vmul.f32 %v2028_v35, %v2155_v62 }
 0x1c9   :  { %v1236_v61 = vpop.xlane.xlu0 %1235 }
 0x1ca   :  { %1201 = vadd.xlane.f32.xlu1 %v1176_v49 }
 0x1cb   :  { %v978_v22 = vpop.xlane.xlu1 %977 }
 0x1cc   :  { %1303 = vadd.xlane.f32.xlu0 %v1279_v17  ;;  %v970_v17 = vmul.f32 %v2028_v35, %v2169_v45 }
 0x1cd   :  { %v976_v26 = vpop.xlane.xlu0 %975 }
 0x1ce   :  { %v1320_v33 = vsel %vm1319_vm0, %v924_v11, %v976_v26  ;;  %1305 = vadd.xlane.f32.xlu1 %v1280_v18  ;;  %v1126_v11 = vmul.f32 %v1996_v16, %v2161_v39 }
 0x1cf   :  { %v1082_v4 = vpop.xlane.xlu1 %1081  ;;  %v1337_v28 = vsel %vm1336_vm1, %v1320_v33, %v1028_v51 }
 0x1d0   :  { %943 = vadd.xlane.f32.xlu0 %v917_v46  ;;  %v1073_v46 = vmul.f32 %v2050_v52, %v2157_v32 }
 0x1d1   :  { %v1080_v7 = vpop.xlane.xlu0 %1079 }
 0x1d2   :  { %v1354_v23 = vsel %vm1353_vm2, %v1337_v28, %v1080_v7  ;;  %945 = vadd.xlane.f32.xlu1 %v918_v6  ;;  %v1177_v6 = vmul.f32 %v2067_v1, %v2155_v62  ;;  %v1281_v7 = vmul.f32 %v2089_v20, %v2157_v32  ;;  %v920_v32 = vmul.f32 %v1974_v63, %v2211_v15 }
 0x1d3   :  { %v1186_v59 = vpop.xlane.xlu1 %1185  ;;  %v1371_v21 = vsel %vm1370_vm3, %v1354_v23, %v1132_v53 }
 0x1d4   :  { %1047 = vadd.xlane.f32.xlu0 %v1021_v44 }
 0x1d5   :  { %v1184_v5 = vpop.xlane.xlu0 %1183 }
 0x1d6   :  { %v1388_v30 = vsel %vm1387_vm4, %v1371_v21, %v1184_v5  ;;  %1049 = vadd.xlane.f32.xlu1 %v1022_v54  ;;  %v919_v54 = vmul.f32 %v1974_v63, %v2201_v9 }
 0x1d7   :  { %v1290_v3 = vpop.xlane.xlu1 %1289  ;;  %v1405_v31 = vsel %vm1404_vm5, %v1388_v30, %v1236_v61 }
 0x1d8   :  { %1151 = vadd.xlane.f32.xlu0 %v1125_v13 }
 0x1d9   :  { %v1288_v42 = vpop.xlane.xlu0 %1287 }
 0x1da   :  { %v1422_v51 = vsel %vm1421_vm6, %v1405_v31, %v1288_v42  ;;  %1153 = vadd.xlane.f32.xlu1 %v1126_v11  ;;  %v1024_v42 = vmul.f32 %v1984_v8, %v2227_v57 }
 0x1db   :  { %1439 = vst.msk [vmem:[%s2660_s5] sm:$0xff] %vm1438_vm7, %v1422_v51  ;;  %v928_v19 = vpop.xlane.xlu1 %927 }
 0x1dc   :  { %1255 = vadd.xlane.f32.xlu0 %v1229_v43 }
 0x1dd   :  { %v926_v39 = vpop.xlane.xlu0 %925 }
 0x1de   :  { %v1321_v53 = vsel %vm1319_vm0, %v926_v39, %v978_v22  ;;  %1257 = vadd.xlane.f32.xlu1 %v1230_v60  ;;  %v1127_v60 = vmul.f32 %v1996_v16, %v2201_v9 }
 0x1df   :  { %v1338_v14 = vsel %vm1336_vm1, %v1321_v53, %v2333_v41  ;;  %v930_v49 = vpop.xlane.xlu1 %929 }
 0x1e0   :  { %v1355_v61 = vsel %vm1353_vm2, %v1338_v14, %v1082_v4  ;;  %995 = vadd.xlane.f32.xlu0 %v969_v48  ;;  %v1074_v4 = vmul.f32 %v2050_v52, %v2171_v47  ;;  %v1128_v14 = vmul.f32 %v1996_v16, %v2211_v15 }
 0x1e1   :  { %v1372_v40 = vsel %vm1370_vm3, %v1355_v61, %v2339_v50  ;;  %v1032_v18 = vpop.xlane.xlu0 %1031 }
 0x1e2   :  { %v1389_v22 = vsel %vm1387_vm4, %v1372_v40, %v1186_v59  ;;  %997 = vadd.xlane.f32.xlu1 %v970_v17  ;;  %v1282_v59 = vmul.f32 %v2089_v20, %v2171_v47  ;;  %v1231_v40 = vmul.f32 %v2012_v27, %v2215_v29 }
 0x1e3   :  { %v1406_v41 = vsel %vm1404_vm5, %v1389_v22, %v2345_v58  ;;  %v1034_v26 = vpop.xlane.xlu1 %1033  ;;  %v1178_v58 = vmul.f32 %v2067_v1, %v2169_v45  ;;  %v1023_v45 = vmul.f32 %v1984_v8, %v2215_v29  ;;  %v1232_v22 = vmul.f32 %v2012_v27, %v2227_v57 }
 0x1e4   :  { %v1423_v33 = vsel %vm1421_vm6, %v1406_v41, %v1290_v3  ;;  %1099 = vadd.xlane.f32.xlu0 %v1073_v46  ;;  %v971_v41 = vmul.f32 %v2028_v35, %v2203_v10  ;;  %v1075_v57 = vmul.f32 %v2050_v52, %v2219_v34 }
 0x1e5   :  { %1440 = vst.msk [vmem:[%s2660_s5 + $0x8] sm:$0xff] %vm1438_vm7, %v1423_v33  ;;  %v1136_v50 = vpop.xlane.xlu0 %1135  ;;  %v972_v33 = vmul.f32 %v2028_v35, %v2213_v36 }
 0x1e6   :  { %1101 = vadd.xlane.f32.xlu1 %v1074_v4 }
 0x1e7   :  { %v1138_v44 = vpop.xlane.xlu1 %1137 }
 0x1e8   :  { %1203 = vadd.xlane.f32.xlu0 %v1177_v6  ;;  %v1076_v6 = vmul.f32 %v2050_v52, %v2229_v0 }
 0x1e9   :  { %v1240_v28 = vpop.xlane.xlu0 %1239 }
 0x1ea   :  { %1205 = vadd.xlane.f32.xlu1 %v1178_v58  ;;  %v1179_v58 = vmul.f32 %v2067_v1, %v2203_v10 }
 0x1eb   :  { %v1242_v23 = vpop.xlane.xlu1 %1241 }
 0x1ec   :  { %1307 = vadd.xlane.f32.xlu0 %v1281_v7  ;;  %v1180_v7 = vmul.f32 %v2067_v1, %v2213_v36  ;;  %v922_v36 = vmul.f32 %v1974_v63, %v2267_v37 }
 0x1ed   :  { %v980_v21 = vpop.xlane.xlu0 %979 }
 0x1ee   :  { %v1322_v62 = vsel %vm1319_vm0, %v928_v19, %v980_v21  ;;  %1309 = vadd.xlane.f32.xlu1 %v1282_v59  ;;  %v1283_v59 = vmul.f32 %v2089_v20, %v2219_v34  ;;  %v1284_v21 = vmul.f32 %v2089_v20, %v2229_v0  ;;  %v1025_v34 = vmul.f32 %v1984_v8, %v2271_v55 }
 0x1ef   :  { %v982_v5 = vpop.xlane.xlu1 %981  ;;  %v1339_v13 = vsel %vm1336_vm1, %v1322_v62, %v1032_v18  ;;  %v921_v62 = vmul.f32 %v1974_v63, %v2257_v56 }
 0x1f0   :  { %v1323_v30 = vsel %vm1319_vm0, %v930_v49, %v982_v5  ;;  %947 = vadd.xlane.f32.xlu0 %v919_v54 }
 0x1f1   :  { %v1084_v47 = vpop.xlane.xlu0 %1083  ;;  %v1340_v11 = vsel %vm1336_vm1, %v1323_v30, %v1034_v26 }
 0x1f2   :  { %v1356_v3 = vsel %vm1353_vm2, %v1339_v13, %v1084_v47  ;;  %949 = vadd.xlane.f32.xlu1 %v920_v32 }
 0x1f3   :  { %v1086_v31 = vpop.xlane.xlu1 %1085  ;;  %v1373_v43 = vsel %vm1370_vm3, %v1356_v3, %v1136_v50 }
 0x1f4   :  { %v1357_v51 = vsel %vm1353_vm2, %v1340_v11, %v1086_v31  ;;  %1051 = vadd.xlane.f32.xlu0 %v1023_v45  ;;  %v1026_v11 = vmul.f32 %v1984_v8, %v2283_v38 }
 0x1f5   :  { %v1188_v19 = vpop.xlane.xlu0 %1187  ;;  %v1374_v53 = vsel %vm1370_vm3, %v1357_v51, %v1138_v44  ;;  %v1129_v51 = vmul.f32 %v1996_v16, %v2257_v56 }
 0x1f6   :  { %v1390_v39 = vsel %vm1387_vm4, %v1373_v43, %v1188_v19  ;;  %1053 = vadd.xlane.f32.xlu1 %v1024_v42 }
 0x1f7   :  { %v1190_v48 = vpop.xlane.xlu1 %1189  ;;  %v1407_v61 = vsel %vm1404_vm5, %v1390_v39, %v1240_v28  ;;  %v1130_v39 = vmul.f32 %v1996_v16, %v2267_v37  ;;  %v1234_v37 = vmul.f32 %v2012_v27, %v2283_v38 }
 0x1f8   :  { %v1391_v49 = vsel %vm1387_vm4, %v1374_v53, %v1190_v48  ;;  %1155 = vadd.xlane.f32.xlu0 %v1127_v60 }
 0x1f9   :  { %v1292_v17 = vpop.xlane.xlu0 %1291  ;;  %v1408_v18 = vsel %vm1404_vm5, %v1391_v49, %v1242_v23 }
 0x1fa   :  { %v1424_v9 = vsel %vm1421_vm6, %v1407_v61, %v1292_v17  ;;  %1157 = vadd.xlane.f32.xlu1 %v1128_v14  ;;  %v1233_v14 = vmul.f32 %v2012_v27, %v2271_v55  ;;  %v973_v17 = vmul.f32 %v2028_v35, %v2259_v12  ;;  %v1077_v27 = vmul.f32 %v2050_v52, %v2275_v24 }
 0x1fb   :  { %1441 = vst.msk [vmem:[%s2660_s5 + $0x10] sm:$0xff] %vm1438_vm7, %v1424_v9  ;;  %v1294_v15 = vpop.xlane.xlu1 %1293  ;;  %v974_v9 = vmul.f32 %v2028_v35, %v2269_v2  ;;  %v1182_v35 = vmul.f32 %v2067_v1, %v2269_v2 }
 0x1fc   :  { %v1425_v46 = vsel %vm1421_vm6, %v1408_v18, %v1294_v15  ;;  %1259 = vadd.xlane.f32.xlu0 %v1231_v40  ;;  %v1078_v15 = vmul.f32 %v2050_v52, %v2285_v25  ;;  %v1286_v52 = vmul.f32 %v2089_v20, %v2285_v25 }
 0x1fd   :  { %1442 = vst.msk [vmem:[%s2660_s5 + $0x18] sm:$0xff] %vm1438_vm7, %v1425_v46  ;;  %v932_v29 = vpop.xlane.xlu0 %931  ;;  %v1181_v46 = vmul.f32 %v2067_v1, %v2259_v12 }
 0x1fe   :  { %1261 = vadd.xlane.f32.xlu1 %v1232_v22 }
 0x1ff   :  { %v934_v26 = vpop.xlane.xlu1 %933 }
 0x200   :  { %999 = vadd.xlane.f32.xlu0 %v971_v41 }
 0x201   :  { %v1036_v4 = vpop.xlane.xlu0 %1035 }
 0x202   :  { %1001 = vadd.xlane.f32.xlu1 %v972_v33 }
 0x203   :  { %v1038_v50 = vpop.xlane.xlu1 %1037 }
 0x204   :  { %1103 = vadd.xlane.f32.xlu0 %v1075_v57 }
 0x205   :  { %v1140_v44 = vpop.xlane.xlu0 %1139 }
 0x206   :  { %1105 = vadd.xlane.f32.xlu1 %v1076_v6 }
 0x207   :  { %v1142_v28 = vpop.xlane.xlu1 %1141 }
 0x208   :  { %1207 = vadd.xlane.f32.xlu0 %v1179_v58 }
 0x209   :  { %v1244_v23 = vpop.xlane.xlu0 %1243 }
 0x20a   :  { %1209 = vadd.xlane.f32.xlu1 %v1180_v7 }
 0x20b   :  { %v1246_v54 = vpop.xlane.xlu1 %1245 }
 0x20c   :  { %1311 = vadd.xlane.f32.xlu0 %v1283_v59 }
 0x20d   :  { %v984_v10 = vpop.xlane.xlu0 %983 }
 0x20e   :  { %v1324_v5 = vsel %vm1319_vm0, %v932_v29, %v984_v10  ;;  %1313 = vadd.xlane.f32.xlu1 %v1284_v21 }
 0x20f   :  { %v986_v45 = vpop.xlane.xlu1 %985  ;;  %v1341_v0 = vsel %vm1336_vm1, %v1324_v5, %v1036_v4 }
 0x210   :  { %v1325_v30 = vsel %vm1319_vm0, %v934_v26, %v986_v45  ;;  %951 = vadd.xlane.f32.xlu0 %v921_v62  ;;  %v1285_v26 = vmul.f32 %v2089_v20, %v2275_v24 }
 0x211   :  { %v1088_v32 = vpop.xlane.xlu0 %1087  ;;  %v1342_v47 = vsel %vm1336_vm1, %v1325_v30, %v1038_v50 }
 0x212   :  { %v1358_v13 = vsel %vm1353_vm2, %v1341_v0, %v1088_v32  ;;  %953 = vadd.xlane.f32.xlu1 %v922_v36 }
 0x213   :  { %v1090_v3 = vpop.xlane.xlu1 %1089  ;;  %v1375_v31 = vsel %vm1370_vm3, %v1358_v13, %v1140_v44 }
 0x214   :  { %v1359_v63 = vsel %vm1353_vm2, %v1342_v47, %v1090_v3  ;;  %1055 = vadd.xlane.f32.xlu0 %v1025_v34 }
 0x215   :  { %v1192_v42 = vpop.xlane.xlu0 %1191  ;;  %v1376_v19 = vsel %vm1370_vm3, %v1359_v63, %v1142_v28 }
 0x216   :  { %v1392_v43 = vsel %vm1387_vm4, %v1375_v31, %v1192_v42  ;;  %1057 = vadd.xlane.f32.xlu1 %v1026_v11 }
 0x217   :  { %v1194_v60 = vpop.xlane.xlu1 %1193  ;;  %v1409_v53 = vsel %vm1404_vm5, %v1392_v43, %v1244_v23  ;;  %v1631_v50 = vpop.f32.mrb[32].mxu0 }
 0x218   :  { %v1393_v8 = vsel %vm1387_vm4, %v1376_v19, %v1194_v60  ;;  %1159 = vadd.xlane.f32.xlu0 %v1129_v51  ;;  %v1639_v57 = vpop.f32.mrb[32].mxu1  ;;  %888 = vst [vmem:[#allocation9 + $0x10] sm:$0xff] %v1631_v50  ;;  %v599_v2 = vpop.f32.mrb[33].mxu0 }
 0x219   :  { %v1296_v48 = vpop.xlane.xlu0 %1295  ;;  %v1410_v49 = vsel %vm1404_vm5, %v1393_v8, %v1246_v54  ;;  %896 = vst [vmem:[#allocation9 + $0x50] sm:$0xff] %v1639_v57  ;;  %v631_v6 = vpop.f32.mrb[33].mxu1  ;;  %886 = vst [vmem:[#allocation9] sm:$0xff] %v599_v2 }
 0x21a   :  { %v1426_v56 = vsel %vm1421_vm6, %v1409_v53, %v1296_v48  ;;  %1161 = vadd.xlane.f32.xlu1 %v1130_v39  ;;  %894 = vst [vmem:[#allocation9 + $0x40] sm:$0xff] %v631_v6  ;;  %v1640_v44 = vpop.f32.mrb[34].mxu1  ;;  %v1632_v58 = vpop.f32.mrb[34].mxu0 }
 0x21b   :  { %1443 = vst.msk [vmem:[%s2660_s5 + $0x20] sm:$0xff] %vm1438_vm7, %v1426_v56  ;;  %v1298_v16 = vpop.xlane.xlu1 %1297  ;;  %897 = vst [vmem:[#allocation9 + $0x58] sm:$0xff] %v1640_v44  ;;  %v602_v28 = vpop.f32.mrb[35].mxu0 }
 0x21c   :  { %v1427_v61 = vsel %vm1421_vm6, %v1410_v49, %v1298_v16  ;;  %1263 = vadd.xlane.f32.xlu0 %v1233_v14  ;;  %889 = vst [vmem:[#allocation9 + $0x18] sm:$0xff] %v1632_v58  ;;  %887 = vst [vmem:[#allocation9 + $0x8] sm:$0xff] %v602_v28  ;;  %v634_v23 = vpop.f32.mrb[35].mxu1 }
 0x21d   :  { %1444 = vst.msk [vmem:[%s2660_s5 + $0x28] sm:$0xff] %vm1438_vm7, %v1427_v61  ;;  %v936_v55 = vpop.xlane.xlu0 %935  ;;  %895 = vst [vmem:[#allocation9 + $0x48] sm:$0xff] %v634_v23 }
 0x21e   :  { %1265 = vadd.xlane.f32.xlu1 %v1234_v37 }
 0x21f   :  { %v938_v40 = vpop.xlane.xlu1 %937  ;;  %v1635_v36 = vpop.f32.mrb[36].mxu0 }
 0x220   :  { %1003 = vadd.xlane.f32.xlu0 %v973_v17  ;;  %v1643_v5 = vpop.f32.mrb[36].mxu1  ;;  %892 = vst [vmem:[#allocation9 + $0x30] sm:$0xff] %v1635_v36  ;;  %v615_v32 = vpop.f32.mrb[37].mxu0 }
 0x221   :  { %v1040_v18 = vpop.xlane.xlu0 %1039  ;;  %900 = vst [vmem:[#allocation9 + $0x70] sm:$0xff] %v1643_v5  ;;  %v647_v34 = vpop.f32.mrb[37].mxu1  ;;  %890 = vst [vmem:[#allocation9 + $0x20] sm:$0xff] %v615_v32 }
 0x222   :  { %1005 = vadd.xlane.f32.xlu1 %v974_v9  ;;  %898 = vst [vmem:[#allocation9 + $0x60] sm:$0xff] %v647_v34  ;;  %v1644_v47 = vpop.f32.mrb[38].mxu1  ;;  %v1636_v3 = vpop.f32.mrb[38].mxu0 }
 0x223   :  { %v1042_v38 = vpop.xlane.xlu1 %1041  ;;  %901 = vst [vmem:[#allocation9 + $0x78] sm:$0xff] %v1644_v47  ;;  %893 = vst [vmem:[#allocation9 + $0x38] sm:$0xff] %v1636_v3  ;;  %v618_v31 = vpop.f32.mrb[39].mxu0 }
 0x224   :  { %1107 = vadd.xlane.f32.xlu0 %v1077_v27  ;;  %891 = vst [vmem:[#allocation9 + $0x28] sm:$0xff] %v618_v31  ;;  %v650_v51 = vpop.f32.mrb[39].mxu1 }
 0x225   :  { %v1144_v22 = vpop.xlane.xlu0 %1143  ;;  %899 = vst [vmem:[#allocation9 + $0x68] sm:$0xff] %v650_v51 }
 0x226   :  { %1109 = vadd.xlane.f32.xlu1 %v1078_v15 }
 0x227   :  { %v1146_v29 = vpop.xlane.xlu1 %1145 }
 0x228   :  { %1211 = vadd.xlane.f32.xlu0 %v1181_v46 }
 0x229   :  { %v1248_v41 = vpop.xlane.xlu0 %1247 }
 0x22a   :  { %1213 = vadd.xlane.f32.xlu1 %v1182_v35 }
 0x22b   :  { %v1250_v33 = vpop.xlane.xlu1 %1249 }
 0x22c   :  { %1315 = vadd.xlane.f32.xlu0 %v1285_v26 }
 0x22d   :  { %v988_v4 = vpop.xlane.xlu0 %987 }
 0x22e   :  { %v1326_v12 = vsel %vm1319_vm0, %v936_v55, %v988_v4  ;;  %1317 = vadd.xlane.f32.xlu1 %v1286_v52 }
 0x22f   :  { %v990_v1 = vpop.xlane.xlu1 %989  ;;  %v1343_v20 = vsel %vm1336_vm1, %v1326_v12, %v1040_v18 }
 0x230   :  { %v1327_v24 = vsel %vm1319_vm0, %v938_v40, %v990_v1 }
 0x231   :  { %v1092_v25 = vpop.xlane.xlu0 %1091  ;;  %v1344_v59 = vsel %vm1336_vm1, %v1327_v24, %v1042_v38 }
 0x232   :  { %v1360_v7 = vsel %vm1353_vm2, %v1343_v20, %v1092_v25 }
 0x233   :  { %v1094_v54 = vpop.xlane.xlu1 %1093  ;;  %v1377_v62 = vsel %vm1370_vm3, %v1360_v7, %v1144_v22 }
 0x234   :  { %v1361_v21 = vsel %vm1353_vm2, %v1344_v59, %v1094_v54 }
 0x235   :  { %v1196_v10 = vpop.xlane.xlu0 %1195  ;;  %v1378_v30 = vsel %vm1370_vm3, %v1361_v21, %v1146_v29 }
 0x236   :  { %v1394_v45 = vsel %vm1387_vm4, %v1377_v62, %v1196_v10 }
 0x237   :  { %v1198_v0 = vpop.xlane.xlu1 %1197  ;;  %v1411_v11 = vsel %vm1404_vm5, %v1394_v45, %v1248_v41 }
 0x238   :  { %v1395_v13 = vsel %vm1387_vm4, %v1378_v30, %v1198_v0 }
 0x239   :  { %v1300_v63 = vpop.xlane.xlu0 %1299  ;;  %v1412_v43 = vsel %vm1404_vm5, %v1395_v13, %v1250_v33 }
 0x23a   :  { %v1428_v42 = vsel %vm1421_vm6, %v1411_v11, %v1300_v63 }
 0x23b   :  { %1445 = vst.msk [vmem:[%s2660_s5 + $0x30] sm:$0xff] %vm1438_vm7, %v1428_v42  ;;  %v1302_v19 = vpop.xlane.xlu1 %1301 }
 0x23c   :  { %v1429_v60 = vsel %vm1421_vm6, %v1412_v43, %v1302_v19 }
 0x23d   :  { %1446 = vst.msk [vmem:[%s2660_s5 + $0x38] sm:$0xff] %vm1438_vm7, %v1429_v60  ;;  %v940_v39 = vpop.xlane.xlu0 %939 }
 0x23f   :  { %v942_v8 = vpop.xlane.xlu1 %941 }
 0x240   :  { %1806 = shalt.err (!%p1803_p0)
}
 0x241   :  { %s1807_s27 = scalar_lea.hbm %s2658_s3, 4096 }
 0x242   :  { %p1808_p1 = scmp.ne.s32.totalorder %s2658_s3, %s1807_s27  ;;  %p1811_p2 = scmp.lt.u32.totalorder %s1807_s27, %s2658_s3 }
 0x244   :  { %p1813_p3 = pnand %p1811_p2, %p1808_p1 }
 0x246   :  { %1816 = shalt.err (!%p1813_p3)
}
 0x247   :  { %s1856_s2 = smov 256   ;;  %s1857_s6 = smov 16   ;;  %v1044_v53 = vpop.xlane.xlu0 %1043  ;;  %v1046_v48 = vpop.xlane.xlu1 %1045 }
 0x248   :  { %1466 = dma.vmem_to_hbm [thread:$0]  %s1461_s23, 4096, %s2658_s3, [#allocation4], %s1856_s2, %s1856_s2, %s1857_s6  }
 0x249   :  { %s1858_s9 = smov [#allocation9]  }
 0x24a   :  { %s1472_s10 = sshll.u32 %s1858_s9, 4  ;;  %s1473_s10 = int_to_ptr.vmem [resolvable:$true] %s1472_s10 }
 0x24b   :  { %s1817_s11 = scalar_lea.vmem %s1473_s10, 2048  ;;  %p1822_p5 = scmp.lt.s32.totalorder %s1473_s10, %s1473_s10 }
 0x24c   :  { %p1818_p4 = scmp.ne.s32.totalorder %s1473_s10, %s1817_s11  ;;  %p1823_p6 = scmp.lt.s32.totalorder %s1817_s11, %s1817_s11 }
 0x24e   :  { %p1824_p7 = por %p1823_p6, %p1822_p5 }
 0x250   :  { %p1825_p8 = pnand %p1824_p7, %p1818_p4 }
 0x252   :  { %1828 = shalt.err (!%p1825_p8)
}
 0x253   :  { %s1829_s14 = scalar_lea.hbm %s2659_s4, 2048 }
 0x254   :  { %p1830_p9 = scmp.ne.s32.totalorder %s2659_s4, %s1829_s14  ;;  %p1833_p10 = scmp.lt.u32.totalorder %s1829_s14, %s2659_s4 }
 0x256   :  { %p1835_p11 = pnand %p1833_p10, %p1830_p9 }
 0x258   :  { %1838 = shalt.err (!%p1835_p11)
}
 0x259   :  { %1478 = dma.vmem_to_hbm [thread:$0]  %s1473_s10, 2048, %s2659_s4, [#allocation10], %s1851_s1, %s1851_s1, %s1852_s17   ;;  %v1148_v14 = vpop.xlane.xlu0 %1147  ;;  %v1150_v56 = vpop.xlane.xlu1 %1149 }
 0x25d   :  { %v1252_v49 = vpop.xlane.xlu0 %1251  ;;  %v1254_v16 = vpop.xlane.xlu1 %1253 }
 0x261   :  { %v992_v37 = vpop.xlane.xlu0 %991  ;;  %v994_v55 = vpop.xlane.xlu1 %993 }
 0x262   :  { %v1328_v61 = vsel %vm1319_vm0, %v940_v39, %v992_v37  ;;  %v1329_v17 = vsel %vm1319_vm0, %v942_v8, %v994_v55 }
 0x263   :  { %v1345_v40 = vsel %vm1336_vm1, %v1328_v61, %v1044_v53  ;;  %v1346_v27 = vsel %vm1336_vm1, %v1329_v17, %v1046_v48 }
 0x265   :  { %v1096_v9 = vpop.xlane.xlu0 %1095  ;;  %v1098_v38 = vpop.xlane.xlu1 %1097 }
 0x266   :  { %v1362_v18 = vsel %vm1353_vm2, %v1345_v40, %v1096_v9  ;;  %v1363_v15 = vsel %vm1353_vm2, %v1346_v27, %v1098_v38 }
 0x267   :  { %v1379_v22 = vsel %vm1370_vm3, %v1362_v18, %v1148_v14  ;;  %v1380_v35 = vsel %vm1370_vm3, %v1363_v15, %v1150_v56 }
 0x269   :  { %v1200_v46 = vpop.xlane.xlu0 %1199  ;;  %v1202_v41 = vpop.xlane.xlu1 %1201 }
 0x26a   :  { %v1396_v29 = vsel %vm1387_vm4, %v1379_v22, %v1200_v46  ;;  %v1397_v26 = vsel %vm1387_vm4, %v1380_v35, %v1202_v41 }
 0x26b   :  { %v1413_v33 = vsel %vm1404_vm5, %v1396_v29, %v1252_v49  ;;  %v1414_v57 = vsel %vm1404_vm5, %v1397_v26, %v1254_v16 }
 0x26d   :  { %v1304_v52 = vpop.xlane.xlu0 %1303  ;;  %v1306_v12 = vpop.xlane.xlu1 %1305 }
 0x26e   :  { %v1430_v4 = vsel %vm1421_vm6, %v1413_v33, %v1304_v52  ;;  %v1431_v50 = vsel %vm1421_vm6, %v1414_v57, %v1306_v12 }
 0x26f   :  { %1447 = vst.msk [vmem:[%s2660_s5 + $0x40] sm:$0xff] %vm1438_vm7, %v1430_v4  ;;  %1448 = vst.msk [vmem:[%s2660_s5 + $0x48] sm:$0xff] %vm1438_vm7, %v1431_v50 }
 0x271   :  { %v944_v6 = vpop.xlane.xlu0 %943  ;;  %v946_v1 = vpop.xlane.xlu1 %945 }
 0x275   :  { %v1048_v2 = vpop.xlane.xlu0 %1047  ;;  %v1050_v24 = vpop.xlane.xlu1 %1049 }
 0x279   :  { %v1152_v44 = vpop.xlane.xlu0 %1151  ;;  %v1154_v58 = vpop.xlane.xlu1 %1153 }
 0x27d   :  { %v1256_v20 = vpop.xlane.xlu0 %1255  ;;  %v1258_v25 = vpop.xlane.xlu1 %1257 }
 0x281   :  { %v996_v28 = vpop.xlane.xlu0 %995  ;;  %v998_v23 = vpop.xlane.xlu1 %997 }
 0x282   :  { %v1330_v7 = vsel %vm1319_vm0, %v944_v6, %v996_v28  ;;  %v1331_v59 = vsel %vm1319_vm0, %v946_v1, %v998_v23 }
 0x283   :  { %v1347_v54 = vsel %vm1336_vm1, %v1330_v7, %v1048_v2  ;;  %v1348_v10 = vsel %vm1336_vm1, %v1331_v59, %v1050_v24 }
 0x285   :  { %v1100_v21 = vpop.xlane.xlu0 %1099  ;;  %v1102_v5 = vpop.xlane.xlu1 %1101 }
 0x286   :  { %v1364_v62 = vsel %vm1353_vm2, %v1347_v54, %v1100_v21  ;;  %v1365_v45 = vsel %vm1353_vm2, %v1348_v10, %v1102_v5 }
 0x287   :  { %v1381_v36 = vsel %vm1370_vm3, %v1364_v62, %v1152_v44  ;;  %v1382_v0 = vsel %vm1370_vm3, %v1365_v45, %v1154_v58 }
 0x289   :  { %v1204_v34 = vpop.xlane.xlu0 %1203  ;;  %v1206_v32 = vpop.xlane.xlu1 %1205 }
 0x28a   :  { %v1398_v30 = vsel %vm1387_vm4, %v1381_v36, %v1204_v34  ;;  %v1399_v13 = vsel %vm1387_vm4, %v1382_v0, %v1206_v32 }
 0x28b   :  { %v1415_v47 = vsel %vm1404_vm5, %v1398_v30, %v1256_v20  ;;  %v1416_v63 = vsel %vm1404_vm5, %v1399_v13, %v1258_v25 }
 0x28d   :  { %v1308_v3 = vpop.xlane.xlu0 %1307  ;;  %v1310_v31 = vpop.xlane.xlu1 %1309 }
 0x28e   :  { %v1432_v11 = vsel %vm1421_vm6, %v1415_v47, %v1308_v3  ;;  %v1433_v42 = vsel %vm1421_vm6, %v1416_v63, %v1310_v31 }
 0x28f   :  { %1449 = vst.msk [vmem:[%s2660_s5 + $0x50] sm:$0xff] %vm1438_vm7, %v1432_v11  ;;  %1450 = vst.msk [vmem:[%s2660_s5 + $0x58] sm:$0xff] %vm1438_vm7, %v1433_v42 }
 0x291   :  { %v948_v51 = vpop.xlane.xlu0 %947  ;;  %v950_v43 = vpop.xlane.xlu1 %949 }
 0x295   :  { %v1052_v19 = vpop.xlane.xlu0 %1051  ;;  %v1054_v60 = vpop.xlane.xlu1 %1053 }
 0x299   :  { %v1156_v39 = vpop.xlane.xlu0 %1155  ;;  %v1158_v8 = vpop.xlane.xlu1 %1157 }
 0x29d   :  { %v1260_v53 = vpop.xlane.xlu0 %1259  ;;  %v1262_v48 = vpop.xlane.xlu1 %1261 }
 0x2a1   :  { %v1000_v14 = vpop.xlane.xlu0 %999  ;;  %v1002_v49 = vpop.xlane.xlu1 %1001 }
 0x2a2   :  { %v1332_v56 = vsel %vm1319_vm0, %v948_v51, %v1000_v14  ;;  %v1333_v16 = vsel %vm1319_vm0, %v950_v43, %v1002_v49 }
 0x2a3   :  { %v1349_v37 = vsel %vm1336_vm1, %v1332_v56, %v1052_v19  ;;  %v1350_v17 = vsel %vm1336_vm1, %v1333_v16, %v1054_v60 }
 0x2a5   :  { %v1104_v61 = vpop.xlane.xlu0 %1103  ;;  %v1106_v40 = vpop.xlane.xlu1 %1105 }
 0x2a6   :  { %v1366_v55 = vsel %vm1353_vm2, %v1349_v37, %v1104_v61  ;;  %v1367_v9 = vsel %vm1353_vm2, %v1350_v17, %v1106_v40 }
 0x2a7   :  { %v1383_v18 = vsel %vm1370_vm3, %v1366_v55, %v1156_v39  ;;  %v1384_v15 = vsel %vm1370_vm3, %v1367_v9, %v1158_v8 }
 0x2a9   :  { %v1208_v27 = vpop.xlane.xlu0 %1207  ;;  %v1210_v22 = vpop.xlane.xlu1 %1209 }
 0x2aa   :  { %v1400_v38 = vsel %vm1387_vm4, %v1383_v18, %v1208_v27  ;;  %v1401_v46 = vsel %vm1387_vm4, %v1384_v15, %v1210_v22 }
 0x2ab   :  { %v1417_v29 = vsel %vm1404_vm5, %v1400_v38, %v1260_v53  ;;  %v1418_v26 = vsel %vm1404_vm5, %v1401_v46, %v1262_v48 }
 0x2ad   :  { %v1312_v35 = vpop.xlane.xlu0 %1311  ;;  %v1314_v33 = vpop.xlane.xlu1 %1313 }
 0x2ae   :  { %v1434_v41 = vsel %vm1421_vm6, %v1417_v29, %v1312_v35  ;;  %v1435_v52 = vsel %vm1421_vm6, %v1418_v26, %v1314_v33 }
 0x2af   :  { %1451 = vst.msk [vmem:[%s2660_s5 + $0x60] sm:$0xff] %vm1438_vm7, %v1434_v41  ;;  %1452 = vst.msk [vmem:[%s2660_s5 + $0x68] sm:$0xff] %vm1438_vm7, %v1435_v52 }
 0x2b1   :  { %v952_v4 = vpop.xlane.xlu0 %951  ;;  %v954_v57 = vpop.xlane.xlu1 %953 }
 0x2b5   :  { %v1056_v12 = vpop.xlane.xlu0 %1055  ;;  %v1058_v50 = vpop.xlane.xlu1 %1057 }
 0x2b9   :  { %v1160_v6 = vpop.xlane.xlu0 %1159  ;;  %v1162_v1 = vpop.xlane.xlu1 %1161 }
 0x2bd   :  { %v1264_v2 = vpop.xlane.xlu0 %1263  ;;  %v1266_v24 = vpop.xlane.xlu1 %1265 }
 0x2c1   :  { %v1004_v44 = vpop.xlane.xlu0 %1003  ;;  %v1006_v20 = vpop.xlane.xlu1 %1005 }
 0x2c2   :  { %v1334_v58 = vsel %vm1319_vm0, %v952_v4, %v1004_v44  ;;  %v1335_v25 = vsel %vm1319_vm0, %v954_v57, %v1006_v20 }
 0x2c3   :  { %v1351_v28 = vsel %vm1336_vm1, %v1334_v58, %v1056_v12  ;;  %v1352_v59 = vsel %vm1336_vm1, %v1335_v25, %v1058_v50 }
 0x2c5   :  { %v1108_v7 = vpop.xlane.xlu0 %1107  ;;  %v1110_v54 = vpop.xlane.xlu1 %1109 }
 0x2c6   :  { %v1368_v23 = vsel %vm1353_vm2, %v1351_v28, %v1108_v7  ;;  %v1369_v21 = vsel %vm1353_vm2, %v1352_v59, %v1110_v54 }
 0x2c7   :  { %v1385_v62 = vsel %vm1370_vm3, %v1368_v23, %v1160_v6  ;;  %v1386_v45 = vsel %vm1370_vm3, %v1369_v21, %v1162_v1 }
 0x2c9   :  { %v1212_v10 = vpop.xlane.xlu0 %1211  ;;  %v1214_v36 = vpop.xlane.xlu1 %1213 }
 0x2ca   :  { %v1402_v5 = vsel %vm1387_vm4, %v1385_v62, %v1212_v10  ;;  %v1403_v34 = vsel %vm1387_vm4, %v1386_v45, %v1214_v36 }
 0x2cb   :  { %v1419_v30 = vsel %vm1404_vm5, %v1402_v5, %v1264_v2  ;;  %v1420_v13 = vsel %vm1404_vm5, %v1403_v34, %v1266_v24 }
 0x2cd   :  { %v1316_v0 = vpop.xlane.xlu0 %1315  ;;  %v1318_v47 = vpop.xlane.xlu1 %1317 }
 0x2ce   :  { %v1436_v32 = vsel %vm1421_vm6, %v1419_v30, %v1316_v0  ;;  %v1437_v3 = vsel %vm1421_vm6, %v1420_v13, %v1318_v47 }
 0x2cf   :  { %1453 = vst.msk [vmem:[%s2660_s5 + $0x70] sm:$0xff] %vm1438_vm7, %v1436_v32  ;;  %1454 = vst.msk [vmem:[%s2660_s5 + $0x78] sm:$0xff] %vm1438_vm7, %v1437_v3 }
 0x2d0   :  { %1843 = dma.done.wait [#allocation4], 4096  }
 0x2d1   :  { %1844 = vsyncadd [#allocation4], 4294963200 }
 0x2d2   :  { %1845 = dma.done.wait [#allocation10], 2048  }
 0x2d3   :  { %1846 = vsyncadd [#allocation10], 4294965248 }
 0x2d4   :  { %1489 = vsyncpa [#allocation3], 1 }
 0x2d5   :  { %1490 = vsyncpa [#allocation6], 1 }
 0x2d6   :  { %1491 = vsyncpa [#allocation4], 1 }
 0x2d7   :  { %1492 = vsyncpa [#allocation10], 1 }

</bundles_post_ra>
